<compile_context>
chip_gen: v5e
topology: v5e:2x2
jax: 0.10.0
libtpu: 0.0.40
codegen_flags: <defaults>
</compile_context>

<pallas_src>
import functools

import jax
import jax.numpy as jnp
from jax.experimental import pallas as pl
from jax.experimental.pallas import tpu as pltpu


# ---------------------------------------------------------------------------
# Tile-size helpers (static, trace-time Python)
# ---------------------------------------------------------------------------
def _pick_tile(dim, target, align):
    """Largest multiple of `align` that divides `dim` and is <= target; else full dim."""
    if dim % align != 0:
        return dim
    best = align
    t = align
    limit = min(target, dim)
    while t <= limit:
        if dim % t == 0:
            best = t
        t += align
    return best


def _pick_head_block(bh, n, hd, budget_bytes=6 * 1024 * 1024):
    """Number of heads per attention grid step, dividing bh, within a VMEM budget."""
    per_head = 4 * (8 * n * hd + 4 * n * n)
    hb = max(1, min(bh, budget_bytes // max(per_head, 1)))
    while bh % hb != 0:
        hb -= 1
    return hb


# ---------------------------------------------------------------------------
# Tiled quantized linear:
#   out = (round(x * (1/sx)) @ q_w + bias) * (sx * sw) [+ residual]
# q_w is pre-quantized (round(w/sw)), bf16, pre-transposed to (K, O).
# ---------------------------------------------------------------------------
def _qlin_kernel(s_ref, x_ref, qw_ref, b_ref, *refs, has_residual):
    if has_residual:
        res_ref, o_ref, acc_ref = refs
    else:
        o_ref, acc_ref = refs
        res_ref = None

    k = pl.program_id(2)

    @pl.when(k == 0)
    def _():
        acc_ref[...] = jnp.zeros_like(acc_ref)

    inv_sx = s_ref[0]                                  # 1 / s_x  (scalar, SMEM)
    qx = jnp.round(x_ref[...] * inv_sx).astype(jnp.bfloat16)   # exact ints <= 127
    acc_ref[...] += jnp.dot(qx, qw_ref[...], preferred_element_type=jnp.float32)

    @pl.when(k == pl.num_programs(2) - 1)
    def _():
        # bias added before the (sx*sw) rescale, matching the torch reference
        out = (acc_ref[...] + b_ref[...]) * s_ref[1]   # s_ref[1] = sx * sw
        if res_ref is not None:
            out = out + res_ref[...]
        o_ref[...] = out.astype(o_ref.dtype)


def quant_linear(x2d, qw_t, sw, bias, abits, *, residual=None,
                 tm=256, tn=512, tk=512):
    """x2d: (M, K) f32; qw_t: (K, O) bf16 pre-quantized; bias: (O,) -> (M, O) f32."""
    M, K = x2d.shape
    O = qw_t.shape[1]
    qp_a = float(2 ** (abits - 1) - 1)

    # per-tensor abs-max activation scale (cheap glue reduction)
    sx = jnp.maximum(jnp.max(jnp.abs(x2d)), 1e-6) / qp_a
    scalars = jnp.stack([1.0 / sx, sx * sw]).astype(jnp.float32)   # (2,) in SMEM

    TM = _pick_tile(M, tm, 8)
    TN = _pick_tile(O, tn, 128)
    TK = _pick_tile(K, tk, 128)
    grid = (M // TM, O // TN, K // TK)

    in_specs = [
        pl.BlockSpec(memory_space=pltpu.MemorySpace.SMEM),        # [1/sx, sx*sw]
        pl.BlockSpec((TM, TK), lambda i, j, k: (i, k)),           # x tile
        pl.BlockSpec((TK, TN), lambda i, j, k: (k, j)),           # q_w tile (bf16)
        pl.BlockSpec((1, TN), lambda i, j, k: (0, j)),            # bias tile
    ]
    args = [scalars, x2d, qw_t, bias.reshape(1, O)]
    if residual is not None:
        in_specs.append(pl.BlockSpec((TM, TN), lambda i, j, k: (i, j)))
        args.append(residual)

    flops = 2 * M * O * K
    bytes_accessed = M * K * 4 + K * O * 2 + M * O * 4 + O * 4
    if residual is not None:
        bytes_accessed += M * O * 4

    return pl.pallas_call(
        functools.partial(_qlin_kernel, has_residual=residual is not None),
        grid=grid,
        out_shape=jax.ShapeDtypeStruct((M, O), jnp.float32),
        in_specs=in_specs,
        out_specs=pl.BlockSpec((TM, TN), lambda i, j, k: (i, j)),
        scratch_shapes=[pltpu.VMEM((TM, TN), jnp.float32)],
        compiler_params=pltpu.CompilerParams(
            dimension_semantics=("parallel", "parallel", "arbitrary"),
            vmem_limit_bytes=32 * 1024 * 1024),
        cost_estimate=pl.CostEstimate(flops=int(flops), transcendentals=0,
                                      bytes_accessed=int(bytes_accessed)),
    )(*args)


# ---------------------------------------------------------------------------
# Row-wise LayerNorm over the channel dim (used for norm1 / norm2)
# ---------------------------------------------------------------------------
def _layernorm_kernel(x_ref, g_ref, b_ref, o_ref, *, eps):
    x = x_ref[...]
    mu = jnp.mean(x, axis=-1, keepdims=True)
    var = jnp.mean(jnp.square(x - mu), axis=-1, keepdims=True)
    o_ref[...] = ((x - mu) * jax.lax.rsqrt(var + eps) * g_ref[...]
                  + b_ref[...]).astype(o_ref.dtype)


def layernorm(x2d, gamma, beta, *, eps=1e-5, tm=1024):
    M, C = x2d.shape
    TM = _pick_tile(M, tm, 8)
    return pl.pallas_call(
        functools.partial(_layernorm_kernel, eps=eps),
        grid=(M // TM,),
        out_shape=jax.ShapeDtypeStruct((M, C), jnp.float32),
        in_specs=[pl.BlockSpec((TM, C), lambda i: (i, 0)),
                  pl.BlockSpec((1, C), lambda i: (0, 0)),
                  pl.BlockSpec((1, C), lambda i: (0, 0))],
        out_specs=pl.BlockSpec((TM, C), lambda i: (i, 0)),
        compiler_params=pltpu.CompilerParams(
            dimension_semantics=("parallel",),
            vmem_limit_bytes=32 * 1024 * 1024),
    )(x2d, gamma.reshape(1, C), beta.reshape(1, C))


# ---------------------------------------------------------------------------
# Fused attention: q/k LayerNorm + scale + QK^T + softmax + PV, batched over
# HB heads per grid step (lane-dense blocks, amortized grid overhead).
# ---------------------------------------------------------------------------
def _attn_kernel(q_ref, k_ref, v_ref, gq_ref, bq_ref, gk_ref, bk_ref, o_ref,
                 *, scale, eps):
    q = q_ref[...]            # (HB, N, hd)
    k = k_ref[...]
    v = v_ref[...]

    def ln(x, g, b):
        mu = jnp.mean(x, axis=-1, keepdims=True)
        var = jnp.mean(jnp.square(x - mu), axis=-1, keepdims=True)
        return (x - mu) * jax.lax.rsqrt(var + eps) * g + b

    qn = ln(q, gq_ref[...], bq_ref[...]) * scale
    kn = ln(k, gk_ref[...], bk_ref[...])

    # Batched matmuls contracting the last dims — no in-kernel transpose.
    s = jnp.einsum('hqd,hkd->hqk', qn, kn,
                   preferred_element_type=jnp.float32)           # (HB, N, N)
    s = s - jnp.max(s, axis=-1, keepdims=True)
    p = jnp.exp(s)
    p = p * pl.reciprocal(jnp.sum(p, axis=-1, keepdims=True), approx=True)
    o_ref[...] = jnp.einsum('hqk,hkd->hqd', p, v,
                            preferred_element_type=jnp.float32).astype(o_ref.dtype)


def fused_attention(q, k, v, gq, bq, gk, bk, scale, *, eps=1e-5):
    """q/k/v: (B*H, N, hd) f32; gq/bq/gk/bk: (hd,) -> (B*H, N, hd) f32."""
    BH, N, hd = q.shape
    HB = _pick_head_block(BH, N, hd)
    seq_spec = pl.BlockSpec((HB, N, hd), lambda i: (i, 0, 0))
    par_spec = pl.BlockSpec((1, 1, hd), lambda i: (0, 0, 0))

    flops = 4 * BH * N * N * hd
    bytes_accessed = 4 * BH * N * hd * 4

    return pl.pallas_call(
        functools.partial(_attn_kernel, scale=scale, eps=eps),
        grid=(BH // HB,),
        out_shape=jax.ShapeDtypeStruct((BH, N, hd), jnp.float32),
        in_specs=[seq_spec, seq_spec, seq_spec,
                  par_spec, par_spec, par_spec, par_spec],
        out_specs=seq_spec,
        compiler_params=pltpu.CompilerParams(
            dimension_semantics=("parallel",),
            vmem_limit_bytes=32 * 1024 * 1024),
        cost_estimate=pl.CostEstimate(flops=int(flops),
                                      transcendentals=int(BH * N * N),
                                      bytes_accessed=int(bytes_accessed)),
    )(q, k, v,
      gq.reshape(1, 1, hd), bq.reshape(1, 1, hd),
      gk.reshape(1, 1, hd), bk.reshape(1, 1, hd))


# ---------------------------------------------------------------------------
# Parameter prep: pre-quantize weights once (outside the forward pass)
# ---------------------------------------------------------------------------
def prepare_params(raw, wbits):
    qp_w = float(2 ** (wbits - 1) - 1)
    p = dict(raw)
    for name in ("qkv", "proj", "fc1", "fc2"):
        w = raw[name + "_w"]
        sw = jnp.maximum(jnp.max(jnp.abs(w)), 1e-6) / qp_w
        # round(w/sw) are integers with |q| <= 127 -> exactly representable in bf16
        p[name + "_qw_t"] = jnp.round(w / sw).astype(jnp.bfloat16).T   # (K, O)
        p[name + "_sw"] = sw.astype(jnp.float32)
        del p[name + "_w"]
    return p


# ---------------------------------------------------------------------------
# Q_Block.forward
# ---------------------------------------------------------------------------
def q_block_forward(x, params, *, num_heads, abits=8):
    B, N, C = x.shape
    hd = C // num_heads
    scale = hd ** (-0.5)
    M = B * N
    x2d = x.reshape(M, C)

    # norm1
    y1 = layernorm(x2d, params["norm1_g"], params["norm1_b"])

    # attention: qkv quantized linear  (M, C) -> (M, 3C)
    qkv = quant_linear(y1, params["qkv_qw_t"], params["qkv_sw"],
                       params["qkv_b"], abits)
    qkv = qkv.reshape(B, N, 3, num_heads, hd).transpose(2, 0, 3, 1, 4)
    q = qkv[0].reshape(B * num_heads, N, hd)
    k = qkv[1].reshape(B * num_heads, N, hd)
    v = qkv[2].reshape(B * num_heads, N, hd)

    o = fused_attention(q, k, v,
                        params["q_gamma"], params["q_beta"],
                        params["k_gamma"], params["k_beta"], scale)
    o2d = o.reshape(B, num_heads, N, hd).transpose(0, 2, 1, 3).reshape(M, C)

    # proj quantized linear with the first residual fused into the epilogue
    h2 = quant_linear(o2d, params["proj_qw_t"], params["proj_sw"],
                      params["proj_b"], abits, residual=x2d)

    # norm2
    y2 = layernorm(h2, params["norm2_g"], params["norm2_b"])

    # MLP: fc1 -> exact (erf) GELU -> fc2 with the second residual fused
    m = quant_linear(y2, params["fc1_qw_t"], params["fc1_sw"],
                     params["fc1_b"], abits)
    m = jax.nn.gelu(m, approximate=False)          # matches torch nn.GELU()
    out = quant_linear(m, params["fc2_qw_t"], params["fc2_sw"],
                       params["fc2_b"], abits, residual=h2)
    return out.reshape(B, N, C)


# ---------------------------------------------------------------------------
# Pure-JAX reference (mirrors the PyTorch module) for a sanity check
# ---------------------------------------------------------------------------
def reference_q_block(x, raw, num_heads, abits, wbits):
    B, N, C = x.shape
    hd = C // num_heads
    scale = hd ** (-0.5)

    def quantize(t, bits):
        qp = 2.0 ** (bits - 1) - 1.0
        s = jnp.maximum(jnp.max(jnp.abs(t)), 1e-6) / qp
        return jnp.round(t / s), s

    def qlinear(t2d, w, b):
        qx, sx = quantize(t2d, abits)
        qw, sw = quantize(w, wbits)
        return (qx @ qw.T + b[None, :]) * (sx * sw)

    def ln(t, g, b, eps=1e-5):
        mu = jnp.mean(t, -1, keepdims=True)
        var = jnp.mean((t - mu) ** 2, -1, keepdims=True)
        return (t - mu) / jnp.sqrt(var + eps) * g + b

    h = x
    y1 = ln(h, raw["norm1_g"], raw["norm1_b"])
    qkv = qlinear(y1.reshape(B * N, C), raw["qkv_w"], raw["qkv_b"])
    qkv = qkv.reshape(B, N, 3, num_heads, hd).transpose(2, 0, 3, 1, 4)
    q, k, v = qkv[0], qkv[1], qkv[2]
    q = ln(q, raw["q_gamma"], raw["q_beta"]) * scale
    k = ln(k, raw["k_gamma"], raw["k_beta"])
    attn = jax.nn.softmax(jnp.einsum('bhqd,bhkd->bhqk', q, k), axis=-1)
    o = jnp.einsum('bhqk,bhkd->bhqd', attn, v)
    o = o.transpose(0, 2, 1, 3).reshape(B, N, C)
    a_out = qlinear(o.reshape(B * N, C), raw["proj_w"], raw["proj_b"])
    h = h + a_out.reshape(B, N, C)
    y2 = ln(h, raw["norm2_g"], raw["norm2_b"])
    m = qlinear(y2.reshape(B * N, C), raw["fc1_w"], raw["fc1_b"])
    m = jax.nn.gelu(m, approximate=False)
    m = qlinear(m, raw["fc2_w"], raw["fc2_b"]).reshape(B, N, C)
    return h + m


if __name__ == "__main__":
    B, N, C, H = 2, 8, 32, 4          # batch=2, tokens=8, dim=32, heads=4 (hd=8)
    mlp_hidden = 4 * C
    abits = wbits = 8
    hd = C // H

    key = jax.random.PRNGKey(0)
    ks = jax.random.split(key, 9)

    x = jax.random.normal(ks[0], (B, N, C), jnp.float32)

    raw = dict(
        qkv_w=jax.random.normal(ks[1], (3 * C, C), jnp.float32) * 0.02,
        qkv_b=jax.random.normal(ks[2], (3 * C,), jnp.float32) * 0.02,
        proj_w=jax.random.normal(ks[3], (C, C), jnp.float32) * 0.02,
        proj_b=jax.random.normal(ks[4], (C,), jnp.float32) * 0.02,
        fc1_w=jax.random.normal(ks[5], (mlp_hidden, C), jnp.float32) * 0.02,
        fc1_b=jax.random.normal(ks[6], (mlp_hidden,), jnp.float32) * 0.02,
        fc2_w=jax.random.normal(ks[7], (C, mlp_hidden), jnp.float32) * 0.02,
        fc2_b=jax.random.normal(ks[8], (C,), jnp.float32) * 0.02,
        # LayerNorm defaults: gamma=1, beta=0
        norm1_g=jnp.ones((C,), jnp.float32), norm1_b=jnp.zeros((C,), jnp.float32),
        norm2_g=jnp.ones((C,), jnp.float32), norm2_b=jnp.zeros((C,), jnp.float32),
        q_gamma=jnp.ones((hd,), jnp.float32), q_beta=jnp.zeros((hd,), jnp.float32),
        k_gamma=jnp.ones((hd,), jnp.float32), k_beta=jnp.zeros((hd,), jnp.float32),
    )

    params = prepare_params(raw, wbits)

    fwd = jax.jit(functools.partial(q_block_forward, num_heads=H, abits=abits))
    out = fwd(x, params)
    jax.block_until_ready(out)
    assert out.shape == (B, N, C)

    ref = reference_q_block(x, raw, H, abits, wbits)
    max_err = float(jnp.max(jnp.abs(out - ref)))
    assert max_err < 2e-2, f"max abs err {max_err}"

    print("KERNEL_OK")
</pallas_src>

<mosaic_0001>
module attributes {stable_mosaic.version = 11 : i64} {
  func.func @_layernorm_kernel(%arg0: i32, %arg1: memref<16x32xf32, #tpu.memory_space<vmem>>, %arg2: memref<1x32xf32, #tpu.memory_space<vmem>>, %arg3: memref<1x32xf32, #tpu.memory_space<vmem>>, %arg4: memref<16x32xf32, #tpu.memory_space<vmem>>) attributes {dimension_semantics = [#tpu.dimension_semantics<parallel>], iteration_bounds = array<i64: 1>, scalar_prefetch = 0 : i64, scratch_operands = 0 : i64, tpu.core_type = #tpu.core_type<tc>, window_params = [{transform_indices = @transform_0, window_bounds = array<i64: 16, 32>}, {pipeline_mode = #tpu.pipeline_mode<synchronous>, transform_indices = @transform_1, window_bounds = array<i64: 1, 32>}, {pipeline_mode = #tpu.pipeline_mode<synchronous>, transform_indices = @transform_2, window_bounds = array<i64: 1, 32>}, {transform_indices = @transform_3, window_bounds = array<i64: 16, 32>}]} {
    %c0 = arith.constant 0 : index
    %c0_0 = arith.constant 0 : index
    %0 = vector.load %arg1[%c0, %c0_0] : memref<16x32xf32, #tpu.memory_space<vmem>>, vector<16x32xf32>
    %cst = arith.constant dense<0.000000e+00> : vector<16xf32>
    %1 = vector.multi_reduction <add>, %0, %cst [1] : vector<16x32xf32> to vector<16xf32>
    %2 = vector.shape_cast %1 : vector<16xf32> to vector<16x1xf32>
    %cst_1 = arith.constant 3.200000e+01 : f32
    %3 = vector.broadcast %cst_1 : f32 to vector<16x1xf32>
    %4 = arith.divf %2, %3 : vector<16x1xf32>
    %5 = vector.broadcast %4 : vector<16x1xf32> to vector<16x32xf32>
    %6 = arith.subf %0, %5 : vector<16x32xf32>
    %7 = arith.mulf %6, %6 : vector<16x32xf32>
    %cst_2 = arith.constant dense<0.000000e+00> : vector<16xf32>
    %8 = vector.multi_reduction <add>, %7, %cst_2 [1] : vector<16x32xf32> to vector<16xf32>
    %9 = vector.shape_cast %8 : vector<16xf32> to vector<16x1xf32>
    %cst_3 = arith.constant 3.200000e+01 : f32
    %10 = vector.broadcast %cst_3 : f32 to vector<16x1xf32>
    %11 = arith.divf %9, %10 : vector<16x1xf32>
    %12 = vector.broadcast %4 : vector<16x1xf32> to vector<16x32xf32>
    %13 = arith.subf %0, %12 : vector<16x32xf32>
    %cst_4 = arith.constant 9.99999974E-6 : f32
    %14 = vector.broadcast %cst_4 : f32 to vector<16x1xf32>
    %15 = arith.addf %11, %14 : vector<16x1xf32>
    %16 = math.rsqrt %15 : vector<16x1xf32>
    %17 = vector.broadcast %16 : vector<16x1xf32> to vector<16x32xf32>
    %18 = arith.mulf %13, %17 : vector<16x32xf32>
    %c0_5 = arith.constant 0 : index
    %c0_6 = arith.constant 0 : index
    %19 = vector.load %arg2[%c0_5, %c0_6] : memref<1x32xf32, #tpu.memory_space<vmem>>, vector<1x32xf32>
    %20 = vector.broadcast %19 : vector<1x32xf32> to vector<16x32xf32>
    %21 = arith.mulf %18, %20 : vector<16x32xf32>
    %c0_7 = arith.constant 0 : index
    %c0_8 = arith.constant 0 : index
    %22 = vector.load %arg3[%c0_7, %c0_8] : memref<1x32xf32, #tpu.memory_space<vmem>>, vector<1x32xf32>
    %23 = vector.broadcast %22 : vector<1x32xf32> to vector<16x32xf32>
    %24 = arith.addf %21, %23 : vector<16x32xf32>
    %c0_9 = arith.constant 0 : index
    %c0_10 = arith.constant 0 : index
    %25 = vector.load %arg4[%c0_9, %c0_10] : memref<16x32xf32, #tpu.memory_space<vmem>>, vector<16x32xf32>
    tpu.vector_store %arg4[%c0_9, %c0_10], %24 {strides = array<i32>} : memref<16x32xf32, #tpu.memory_space<vmem>>, vector<16x32xf32>,
    return
  }
  func.func @transform_0(%arg0: i32) -> (i32, i32) {
    %c0_i32 = arith.constant 0 : i32
    %c0_i32_0 = arith.constant 0 : i32
    return %arg0, %c0_i32 : i32, i32
  }
  func.func @transform_1(%arg0: i32) -> (i32, i32) {
    %c0_i32 = arith.constant 0 : i32
    %c0_i32_0 = arith.constant 0 : i32
    %c0_i32_1 = arith.constant 0 : i32
    return %c0_i32, %c0_i32_0 : i32, i32
  }
  func.func @transform_2(%arg0: i32) -> (i32, i32) {
    %c0_i32 = arith.constant 0 : i32
    %c0_i32_0 = arith.constant 0 : i32
    %c0_i32_1 = arith.constant 0 : i32
    return %c0_i32, %c0_i32_0 : i32, i32
  }
  func.func @transform_3(%arg0: i32) -> (i32, i32) {
    %c0_i32 = arith.constant 0 : i32
    %c0_i32_0 = arith.constant 0 : i32
    return %arg0, %c0_i32 : i32, i32
  }
}

module attributes {stable_mosaic.version = 11 : i64} {
  func.func @_qlin_kernel(%arg0: i32, %arg1: i32, %arg2: i32, %arg3: memref<2xf32, #tpu.memory_space<smem>>, %arg4: memref<16x32xf32, #tpu.memory_space<vmem>>, %arg5: memref<32x96xbf16, #tpu.memory_space<vmem>>, %arg6: memref<1x96xf32, #tpu.memory_space<vmem>>, %arg7: memref<16x96xf32, #tpu.memory_space<vmem>>, %arg8: memref<16x96xf32, #tpu.memory_space<vmem>>) attributes {dimension_semantics = [#tpu.dimension_semantics<parallel>, #tpu.dimension_semantics<parallel>, #tpu.dimension_semantics<arbitrary>], iteration_bounds = array<i64: 1, 1, 1>, scalar_prefetch = 0 : i64, scratch_operands = 1 : i64, tpu.core_type = #tpu.core_type<tc>, window_params = [{transform_indices = @transform_0, window_bounds = array<i64: 2>}, {transform_indices = @transform_1, window_bounds = array<i64: 16, 32>}, {transform_indices = @transform_2, window_bounds = array<i64: 32, 96>}, {transform_indices = @transform_3, window_bounds = array<i64: 1, 96>}, {transform_indices = @transform_4, window_bounds = array<i64: 16, 96>}]} {
    %c0_i32 = arith.constant 0 : i32
    %0 = arith.cmpi eq, %arg2, %c0_i32 : i32
    %1 = arith.extui %0 : i1 to i32
    %c0_i32_0 = arith.constant 0 : i32
    %2 = arith.cmpi ne, %1, %c0_i32_0 : i32
    scf.if %2 {
      %cst_11 = arith.constant 0.000000e+00 : f32
      %17 = vector.broadcast %cst_11 : f32 to vector<16x96xf32>
      %c0_12 = arith.constant 0 : index
      %c0_13 = arith.constant 0 : index
      %18 = vector.load %arg8[%c0_12, %c0_13] : memref<16x96xf32, #tpu.memory_space<vmem>>, vector<16x96xf32>
      tpu.vector_store %arg8[%c0_12, %c0_13], %17 {strides = array<i32>} : memref<16x96xf32, #tpu.memory_space<vmem>>, vector<16x96xf32>,
    } else {
    }
    %c0 = arith.constant 0 : index
    %3 = memref.load %arg3[%c0] : memref<2xf32, #tpu.memory_space<smem>>
    %c0_1 = arith.constant 0 : index
    %c0_2 = arith.constant 0 : index
    %4 = vector.load %arg4[%c0_1, %c0_2] : memref<16x32xf32, #tpu.memory_space<vmem>>, vector<16x32xf32>
    %5 = vector.broadcast %3 : f32 to vector<16x32xf32>
    %6 = arith.mulf %4, %5 : vector<16x32xf32>
    %7 = math.roundeven %6 : vector<16x32xf32>
    %8 = arith.truncf %7 : vector<16x32xf32> to vector<16x32xbf16>
    %c0_3 = arith.constant 0 : index
    %c0_4 = arith.constant 0 : index
    %9 = vector.load %arg8[%c0_3, %c0_4] : memref<16x96xf32, #tpu.memory_space<vmem>>, vector<16x96xf32>
    %c0_5 = arith.constant 0 : index
    %c0_6 = arith.constant 0 : index
    %10 = vector.load %arg5[%c0_5, %c0_6] : memref<32x96xbf16, #tpu.memory_space<vmem>>, vector<32x96xbf16>
    %cst = arith.constant dense<0.000000e+00> : vector<16x96xf32>
    %11 = tpu.matmul %8, %10, %cst {dimension_numbers = #tpu.dot_dimension_numbers<[1], [0], [0], [1], [0, 0, 1, 1], [], []>} : vector<16x32xbf16>, vector<32x96xbf16>, vector<16x96xf32> -> vector<16x96xf32>
    %12 = arith.addf %9, %11 : vector<16x96xf32>
    %c0_7 = arith.constant 0 : index
    %c0_8 = arith.constant 0 : index
    %13 = vector.load %arg8[%c0_7, %c0_8] : memref<16x96xf32, #tpu.memory_space<vmem>>, vector<16x96xf32>
    tpu.vector_store %arg8[%c0_7, %c0_8], %12 {strides = array<i32>} : memref<16x96xf32, #tpu.memory_space<vmem>>, vector<16x96xf32>,
    %c0_i32_9 = arith.constant 0 : i32
    %14 = arith.cmpi eq, %arg2, %c0_i32_9 : i32
    %15 = arith.extui %14 : i1 to i32
    %c0_i32_10 = arith.constant 0 : i32
    %16 = arith.cmpi ne, %15, %c0_i32_10 : i32
    scf.if %16 {
      %c0_11 = arith.constant 0 : index
      %c0_12 = arith.constant 0 : index
      %17 = vector.load %arg8[%c0_11, %c0_12] : memref<16x96xf32, #tpu.memory_space<vmem>>, vector<16x96xf32>
      %c0_13 = arith.constant 0 : index
      %c0_14 = arith.constant 0 : index
      %18 = vector.load %arg6[%c0_13, %c0_14] : memref<1x96xf32, #tpu.memory_space<vmem>>, vector<1x96xf32>
      %19 = vector.broadcast %18 : vector<1x96xf32> to vector<16x96xf32>
      %20 = arith.addf %17, %19 : vector<16x96xf32>
      %c1 = arith.constant 1 : index
      %21 = memref.load %arg3[%c1] : memref<2xf32, #tpu.memory_space<smem>>
      %22 = vector.broadcast %21 : f32 to vector<16x96xf32>
      %23 = arith.mulf %20, %22 : vector<16x96xf32>
      %c0_15 = arith.constant 0 : index
      %c0_16 = arith.constant 0 : index
      %24 = vector.load %arg7[%c0_15, %c0_16] : memref<16x96xf32, #tpu.memory_space<vmem>>, vector<16x96xf32>
      tpu.vector_store %arg7[%c0_15, %c0_16], %23 {strides = array<i32>} : memref<16x96xf32, #tpu.memory_space<vmem>>, vector<16x96xf32>,
    } else {
    }
    return
  }
  func.func @transform_0(%arg0: i32, %arg1: i32, %arg2: i32) -> i32 {
    %c0_i32 = arith.constant 0 : i32
    %c0_i32_0 = arith.constant 0 : i32
    return %c0_i32 : i32
  }
  func.func @transform_1(%arg0: i32, %arg1: i32, %arg2: i32) -> (i32, i32) {
    %c0_i32 = arith.constant 0 : i32
    return %arg0, %arg2 : i32, i32
  }
  func.func @transform_2(%arg0: i32, %arg1: i32, %arg2: i32) -> (i32, i32) {
    %c0_i32 = arith.constant 0 : i32
    return %arg2, %arg1 : i32, i32
  }
  func.func @transform_3(%arg0: i32, %arg1: i32, %arg2: i32) -> (i32, i32) {
    %c0_i32 = arith.constant 0 : i32
    %c0_i32_0 = arith.constant 0 : i32
    return %c0_i32, %arg1 : i32, i32
  }
  func.func @transform_4(%arg0: i32, %arg1: i32, %arg2: i32) -> (i32, i32) {
    %c0_i32 = arith.constant 0 : i32
    return %arg0, %arg1 : i32, i32
  }
}

module attributes {stable_mosaic.version = 11 : i64} {
  func.func @_attn_kernel(%arg0: i32, %arg1: memref<8x8x8xf32, #tpu.memory_space<vmem>>, %arg2: memref<8x8x8xf32, #tpu.memory_space<vmem>>, %arg3: memref<8x8x8xf32, #tpu.memory_space<vmem>>, %arg4: memref<1x1x8xf32, #tpu.memory_space<vmem>>, %arg5: memref<1x1x8xf32, #tpu.memory_space<vmem>>, %arg6: memref<1x1x8xf32, #tpu.memory_space<vmem>>, %arg7: memref<1x1x8xf32, #tpu.memory_space<vmem>>, %arg8: memref<8x8x8xf32, #tpu.memory_space<vmem>>) attributes {dimension_semantics = [#tpu.dimension_semantics<parallel>], iteration_bounds = array<i64: 1>, scalar_prefetch = 0 : i64, scratch_operands = 0 : i64, tpu.core_type = #tpu.core_type<tc>, window_params = [{transform_indices = @transform_0, window_bounds = array<i64: 8, 8, 8>}, {transform_indices = @transform_1, window_bounds = array<i64: 8, 8, 8>}, {transform_indices = @transform_2, window_bounds = array<i64: 8, 8, 8>}, {pipeline_mode = #tpu.pipeline_mode<synchronous>, transform_indices = @transform_3, window_bounds = array<i64: 1, 1, 8>}, {pipeline_mode = #tpu.pipeline_mode<synchronous>, transform_indices = @transform_4, window_bounds = array<i64: 1, 1, 8>}, {pipeline_mode = #tpu.pipeline_mode<synchronous>, transform_indices = @transform_5, window_bounds = array<i64: 1, 1, 8>}, {pipeline_mode = #tpu.pipeline_mode<synchronous>, transform_indices = @transform_6, window_bounds = array<i64: 1, 1, 8>}, {transform_indices = @transform_7, window_bounds = array<i64: 8, 8, 8>}]} {
    %c0 = arith.constant 0 : index
    %c0_0 = arith.constant 0 : index
    %c0_1 = arith.constant 0 : index
    %0 = vector.load %arg1[%c0, %c0_0, %c0_1] : memref<8x8x8xf32, #tpu.memory_space<vmem>>, vector<8x8x8xf32>
    %c0_2 = arith.constant 0 : index
    %c0_3 = arith.constant 0 : index
    %c0_4 = arith.constant 0 : index
    %1 = vector.load %arg2[%c0_2, %c0_3, %c0_4] : memref<8x8x8xf32, #tpu.memory_space<vmem>>, vector<8x8x8xf32>
    %c0_5 = arith.constant 0 : index
    %c0_6 = arith.constant 0 : index
    %c0_7 = arith.constant 0 : index
    %2 = vector.load %arg3[%c0_5, %c0_6, %c0_7] : memref<8x8x8xf32, #tpu.memory_space<vmem>>, vector<8x8x8xf32>
    %c0_8 = arith.constant 0 : index
    %c0_9 = arith.constant 0 : index
    %c0_10 = arith.constant 0 : index
    %3 = vector.load %arg4[%c0_8, %c0_9, %c0_10] : memref<1x1x8xf32, #tpu.memory_space<vmem>>, vector<1x1x8xf32>
    %c0_11 = arith.constant 0 : index
    %c0_12 = arith.constant 0 : index
    %c0_13 = arith.constant 0 : index
    %4 = vector.load %arg5[%c0_11, %c0_12, %c0_13] : memref<1x1x8xf32, #tpu.memory_space<vmem>>, vector<1x1x8xf32>
    %cst = arith.constant dense<0.000000e+00> : vector<8x8xf32>
    %5 = vector.multi_reduction <add>, %0, %cst [2] : vector<8x8x8xf32> to vector<8x8xf32>
    %6 = vector.shape_cast %5 : vector<8x8xf32> to vector<8x8x1xf32>
    %cst_14 = arith.constant 8.000000e+00 : f32
    %7 = vector.broadcast %cst_14 : f32 to vector<8x8x1xf32>
    %8 = arith.divf %6, %7 : vector<8x8x1xf32>
    %9 = vector.broadcast %8 : vector<8x8x1xf32> to vector<8x8x8xf32>
    %10 = arith.subf %0, %9 : vector<8x8x8xf32>
    %11 = arith.mulf %10, %10 : vector<8x8x8xf32>
    %cst_15 = arith.constant dense<0.000000e+00> : vector<8x8xf32>
    %12 = vector.multi_reduction <add>, %11, %cst_15 [2] : vector<8x8x8xf32> to vector<8x8xf32>
    %13 = vector.shape_cast %12 : vector<8x8xf32> to vector<8x8x1xf32>
    %cst_16 = arith.constant 8.000000e+00 : f32
    %14 = vector.broadcast %cst_16 : f32 to vector<8x8x1xf32>
    %15 = arith.divf %13, %14 : vector<8x8x1xf32>
    %16 = vector.broadcast %8 : vector<8x8x1xf32> to vector<8x8x8xf32>
    %17 = arith.subf %0, %16 : vector<8x8x8xf32>
    %cst_17 = arith.constant 9.99999974E-6 : f32
    %18 = vector.broadcast %cst_17 : f32 to vector<8x8x1xf32>
    %19 = arith.addf %15, %18 : vector<8x8x1xf32>
    %20 = math.rsqrt %19 : vector<8x8x1xf32>
    %21 = vector.broadcast %20 : vector<8x8x1xf32> to vector<8x8x8xf32>
    %22 = arith.mulf %17, %21 : vector<8x8x8xf32>
    %23 = vector.broadcast %3 : vector<1x1x8xf32> to vector<8x8x8xf32>
    %24 = arith.mulf %22, %23 : vector<8x8x8xf32>
    %25 = vector.broadcast %4 : vector<1x1x8xf32> to vector<8x8x8xf32>
    %26 = arith.addf %24, %25 : vector<8x8x8xf32>
    %cst_18 = arith.constant 0.353553385 : f32
    %27 = vector.broadcast %cst_18 : f32 to vector<8x8x8xf32>
    %28 = arith.mulf %26, %27 : vector<8x8x8xf32>
    %c0_19 = arith.constant 0 : index
    %c0_20 = arith.constant 0 : index
    %c0_21 = arith.constant 0 : index
    %29 = vector.load %arg6[%c0_19, %c0_20, %c0_21] : memref<1x1x8xf32, #tpu.memory_space<vmem>>, vector<1x1x8xf32>
    %c0_22 = arith.constant 0 : index
    %c0_23 = arith.constant 0 : index
    %c0_24 = arith.constant 0 : index
    %30 = vector.load %arg7[%c0_22, %c0_23, %c0_24] : memref<1x1x8xf32, #tpu.memory_space<vmem>>, vector<1x1x8xf32>
    %cst_25 = arith.constant dense<0.000000e+00> : vector<8x8xf32>
    %31 = vector.multi_reduction <add>, %1, %cst_25 [2] : vector<8x8x8xf32> to vector<8x8xf32>
    %32 = vector.shape_cast %31 : vector<8x8xf32> to vector<8x8x1xf32>
    %cst_26 = arith.constant 8.000000e+00 : f32
    %33 = vector.broadcast %cst_26 : f32 to vector<8x8x1xf32>
    %34 = arith.divf %32, %33 : vector<8x8x1xf32>
    %35 = vector.broadcast %34 : vector<8x8x1xf32> to vector<8x8x8xf32>
    %36 = arith.subf %1, %35 : vector<8x8x8xf32>
    %37 = arith.mulf %36, %36 : vector<8x8x8xf32>
    %cst_27 = arith.constant dense<0.000000e+00> : vector<8x8xf32>
    %38 = vector.multi_reduction <add>, %37, %cst_27 [2] : vector<8x8x8xf32> to vector<8x8xf32>
    %39 = vector.shape_cast %38 : vector<8x8xf32> to vector<8x8x1xf32>
    %cst_28 = arith.constant 8.000000e+00 : f32
    %40 = vector.broadcast %cst_28 : f32 to vector<8x8x1xf32>
    %41 = arith.divf %39, %40 : vector<8x8x1xf32>
    %42 = vector.broadcast %34 : vector<8x8x1xf32> to vector<8x8x8xf32>
    %43 = arith.subf %1, %42 : vector<8x8x8xf32>
    %cst_29 = arith.constant 9.99999974E-6 : f32
    %44 = vector.broadcast %cst_29 : f32 to vector<8x8x1xf32>
    %45 = arith.addf %41, %44 : vector<8x8x1xf32>
    %46 = math.rsqrt %45 : vector<8x8x1xf32>
    %47 = vector.broadcast %46 : vector<8x8x1xf32> to vector<8x8x8xf32>
    %48 = arith.mulf %43, %47 : vector<8x8x8xf32>
    %49 = vector.broadcast %29 : vector<1x1x8xf32> to vector<8x8x8xf32>
    %50 = arith.mulf %48, %49 : vector<8x8x8xf32>
    %51 = vector.broadcast %30 : vector<1x1x8xf32> to vector<8x8x8xf32>
    %52 = arith.addf %50, %51 : vector<8x8x8xf32>
    "tpu.trace_start"() <{level = 10 : i32, message = "hqd,hkd->hqk"}> : () -> ()
    %cst_30 = arith.constant dense<0.000000e+00> : vector<8x8x8xf32>
    %53 = tpu.matmul %28, %52, %cst_30 {dimension_numbers = #tpu.dot_dimension_numbers<[2], [2], [1], [1], [0, 0, 0, 1, 1, 1], [0], [0]>} : vector<8x8x8xf32>, vector<8x8x8xf32>, vector<8x8x8xf32> -> vector<8x8x8xf32>
    "tpu.trace_stop"() : () -> ()
    %cst_31 = arith.constant dense<0xFF800000> : vector<8x8xf32>
    %54 = vector.multi_reduction <maximumf>, %53, %cst_31 [2] : vector<8x8x8xf32> to vector<8x8xf32>
    %55 = vector.shape_cast %54 : vector<8x8xf32> to vector<8x8x1xf32>
    %56 = vector.broadcast %55 : vector<8x8x1xf32> to vector<8x8x8xf32>
    %57 = arith.subf %53, %56 : vector<8x8x8xf32>
    %58 = math.exp %57 : vector<8x8x8xf32>
    %cst_32 = arith.constant dense<0.000000e+00> : vector<8x8xf32>
    %59 = vector.multi_reduction <add>, %58, %cst_32 [2] : vector<8x8x8xf32> to vector<8x8xf32>
    %60 = vector.shape_cast %59 : vector<8x8xf32> to vector<8x8x1xf32>
    %61 = tpu.reciprocal %60 {approx = true} : vector<8x8x1xf32> -> vector<8x8x1xf32>
    %62 = vector.broadcast %61 : vector<8x8x1xf32> to vector<8x8x8xf32>
    %63 = arith.mulf %58, %62 : vector<8x8x8xf32>
    "tpu.trace_start"() <{level = 10 : i32, message = "hqk,hkd->hqd"}> : () -> ()
    %cst_33 = arith.constant dense<0.000000e+00> : vector<8x8x8xf32>
    %64 = tpu.matmul %63, %2, %cst_33 {dimension_numbers = #tpu.dot_dimension_numbers<[2], [1], [1], [2], [0, 0, 0, 1, 1, 2], [0], [0]>} : vector<8x8x8xf32>, vector<8x8x8xf32>, vector<8x8x8xf32> -> vector<8x8x8xf32>
    "tpu.trace_stop"() : () -> ()
    %c0_34 = arith.constant 0 : index
    %c0_35 = arith.constant 0 : index
    %c0_36 = arith.constant 0 : index
    %65 = vector.load %arg8[%c0_34, %c0_35, %c0_36] : memref<8x8x8xf32, #tpu.memory_space<vmem>>, vector<8x8x8xf32>
    tpu.vector_store %arg8[%c0_34, %c0_35, %c0_36], %64 {strides = array<i32>} : memref<8x8x8xf32, #tpu.memory_space<vmem>>, vector<8x8x8xf32>,
    return
  }
  func.func @transform_0(%arg0: i32) -> (i32, i32, i32) {
    %c0_i32 = arith.constant 0 : i32
    %c0_i32_0 = arith.constant 0 : i32
    %c0_i32_1 = arith.constant 0 : i32
    return %arg0, %c0_i32, %c0_i32_0 : i32, i32, i32
  }
  func.func @transform_1(%arg0: i32) -> (i32, i32, i32) {
    %c0_i32 = arith.constant 0 : i32
    %c0_i32_0 = arith.constant 0 : i32
    %c0_i32_1 = arith.constant 0 : i32
    return %arg0, %c0_i32, %c0_i32_0 : i32, i32, i32
  }
  func.func @transform_2(%arg0: i32) -> (i32, i32, i32) {
    %c0_i32 = arith.constant 0 : i32
    %c0_i32_0 = arith.constant 0 : i32
    %c0_i32_1 = arith.constant 0 : i32
    return %arg0, %c0_i32, %c0_i32_0 : i32, i32, i32
  }
  func.func @transform_3(%arg0: i32) -> (i32, i32, i32) {
    %c0_i32 = arith.constant 0 : i32
    %c0_i32_0 = arith.constant 0 : i32
    %c0_i32_1 = arith.constant 0 : i32
    %c0_i32_2 = arith.constant 0 : i32
    return %c0_i32, %c0_i32_0, %c0_i32_1 : i32, i32, i32
  }
  func.func @transform_4(%arg0: i32) -> (i32, i32, i32) {
    %c0_i32 = arith.constant 0 : i32
    %c0_i32_0 = arith.constant 0 : i32
    %c0_i32_1 = arith.constant 0 : i32
    %c0_i32_2 = arith.constant 0 : i32
    return %c0_i32, %c0_i32_0, %c0_i32_1 : i32, i32, i32
  }
  func.func @transform_5(%arg0: i32) -> (i32, i32, i32) {
    %c0_i32 = arith.constant 0 : i32
    %c0_i32_0 = arith.constant 0 : i32
    %c0_i32_1 = arith.constant 0 : i32
    %c0_i32_2 = arith.constant 0 : i32
    return %c0_i32, %c0_i32_0, %c0_i32_1 : i32, i32, i32
  }
  func.func @transform_6(%arg0: i32) -> (i32, i32, i32) {
    %c0_i32 = arith.constant 0 : i32
    %c0_i32_0 = arith.constant 0 : i32
    %c0_i32_1 = arith.constant 0 : i32
    %c0_i32_2 = arith.constant 0 : i32
    return %c0_i32, %c0_i32_0, %c0_i32_1 : i32, i32, i32
  }
  func.func @transform_7(%arg0: i32) -> (i32, i32, i32) {
    %c0_i32 = arith.constant 0 : i32
    %c0_i32_0 = arith.constant 0 : i32
    %c0_i32_1 = arith.constant 0 : i32
    return %arg0, %c0_i32, %c0_i32_0 : i32, i32, i32
  }
}

module attributes {stable_mosaic.version = 11 : i64} {
  func.func @_qlin_kernel(%arg0: i32, %arg1: i32, %arg2: i32, %arg3: memref<2xf32, #tpu.memory_space<smem>>, %arg4: memref<16x32xf32, #tpu.memory_space<vmem>>, %arg5: memref<32x32xbf16, #tpu.memory_space<vmem>>, %arg6: memref<1x32xf32, #tpu.memory_space<vmem>>, %arg7: memref<16x32xf32, #tpu.memory_space<vmem>>, %arg8: memref<16x32xf32, #tpu.memory_space<vmem>>, %arg9: memref<16x32xf32, #tpu.memory_space<vmem>>) attributes {dimension_semantics = [#tpu.dimension_semantics<parallel>, #tpu.dimension_semantics<parallel>, #tpu.dimension_semantics<arbitrary>], iteration_bounds = array<i64: 1, 1, 1>, scalar_prefetch = 0 : i64, scratch_operands = 1 : i64, tpu.core_type = #tpu.core_type<tc>, window_params = [{transform_indices = @transform_0, window_bounds = array<i64: 2>}, {transform_indices = @transform_1, window_bounds = array<i64: 16, 32>}, {transform_indices = @transform_2, window_bounds = array<i64: 32, 32>}, {transform_indices = @transform_3, window_bounds = array<i64: 1, 32>}, {transform_indices = @transform_4, window_bounds = array<i64: 16, 32>}, {transform_indices = @transform_5, window_bounds = array<i64: 16, 32>}]} {
    %c0_i32 = arith.constant 0 : i32
    %0 = arith.cmpi eq, %arg2, %c0_i32 : i32
    %1 = arith.extui %0 : i1 to i32
    %c0_i32_0 = arith.constant 0 : i32
    %2 = arith.cmpi ne, %1, %c0_i32_0 : i32
    scf.if %2 {
      %cst_11 = arith.constant 0.000000e+00 : f32
      %17 = vector.broadcast %cst_11 : f32 to vector<16x32xf32>
      %c0_12 = arith.constant 0 : index
      %c0_13 = arith.constant 0 : index
      %18 = vector.load %arg9[%c0_12, %c0_13] : memref<16x32xf32, #tpu.memory_space<vmem>>, vector<16x32xf32>
      tpu.vector_store %arg9[%c0_12, %c0_13], %17 {strides = array<i32>} : memref<16x32xf32, #tpu.memory_space<vmem>>, vector<16x32xf32>,
    } else {
    }
    %c0 = arith.constant 0 : index
    %3 = memref.load %arg3[%c0] : memref<2xf32, #tpu.memory_space<smem>>
    %c0_1 = arith.constant 0 : index
    %c0_2 = arith.constant 0 : index
    %4 = vector.load %arg4[%c0_1, %c0_2] : memref<16x32xf32, #tpu.memory_space<vmem>>, vector<16x32xf32>
    %5 = vector.broadcast %3 : f32 to vector<16x32xf32>
    %6 = arith.mulf %4, %5 : vector<16x32xf32>
    %7 = math.roundeven %6 : vector<16x32xf32>
    %8 = arith.truncf %7 : vector<16x32xf32> to vector<16x32xbf16>
    %c0_3 = arith.constant 0 : index
    %c0_4 = arith.constant 0 : index
    %9 = vector.load %arg9[%c0_3, %c0_4] : memref<16x32xf32, #tpu.memory_space<vmem>>, vector<16x32xf32>
    %c0_5 = arith.constant 0 : index
    %c0_6 = arith.constant 0 : index
    %10 = vector.load %arg5[%c0_5, %c0_6] : memref<32x32xbf16, #tpu.memory_space<vmem>>, vector<32x32xbf16>
    %cst = arith.constant dense<0.000000e+00> : vector<16x32xf32>
    %11 = tpu.matmul %8, %10, %cst {dimension_numbers = #tpu.dot_dimension_numbers<[1], [0], [0], [1], [0, 0, 1, 1], [], []>} : vector<16x32xbf16>, vector<32x32xbf16>, vector<16x32xf32> -> vector<16x32xf32>
    %12 = arith.addf %9, %11 : vector<16x32xf32>
    %c0_7 = arith.constant 0 : index
    %c0_8 = arith.constant 0 : index
    %13 = vector.load %arg9[%c0_7, %c0_8] : memref<16x32xf32, #tpu.memory_space<vmem>>, vector<16x32xf32>
    tpu.vector_store %arg9[%c0_7, %c0_8], %12 {strides = array<i32>} : memref<16x32xf32, #tpu.memory_space<vmem>>, vector<16x32xf32>,
    %c0_i32_9 = arith.constant 0 : i32
    %14 = arith.cmpi eq, %arg2, %c0_i32_9 : i32
    %15 = arith.extui %14 : i1 to i32
    %c0_i32_10 = arith.constant 0 : i32
    %16 = arith.cmpi ne, %15, %c0_i32_10 : i32
    scf.if %16 {
      %c0_11 = arith.constant 0 : index
      %c0_12 = arith.constant 0 : index
      %17 = vector.load %arg9[%c0_11, %c0_12] : memref<16x32xf32, #tpu.memory_space<vmem>>, vector<16x32xf32>
      %c0_13 = arith.constant 0 : index
      %c0_14 = arith.constant 0 : index
      %18 = vector.load %arg6[%c0_13, %c0_14] : memref<1x32xf32, #tpu.memory_space<vmem>>, vector<1x32xf32>
      %19 = vector.broadcast %18 : vector<1x32xf32> to vector<16x32xf32>
      %20 = arith.addf %17, %19 : vector<16x32xf32>
      %c1 = arith.constant 1 : index
      %21 = memref.load %arg3[%c1] : memref<2xf32, #tpu.memory_space<smem>>
      %22 = vector.broadcast %21 : f32 to vector<16x32xf32>
      %23 = arith.mulf %20, %22 : vector<16x32xf32>
      %c0_15 = arith.constant 0 : index
      %c0_16 = arith.constant 0 : index
      %24 = vector.load %arg7[%c0_15, %c0_16] : memref<16x32xf32, #tpu.memory_space<vmem>>, vector<16x32xf32>
      %25 = arith.addf %23, %24 : vector<16x32xf32>
      %c0_17 = arith.constant 0 : index
      %c0_18 = arith.constant 0 : index
      %26 = vector.load %arg8[%c0_17, %c0_18] : memref<16x32xf32, #tpu.memory_space<vmem>>, vector<16x32xf32>
      tpu.vector_store %arg8[%c0_17, %c0_18], %25 {strides = array<i32>} : memref<16x32xf32, #tpu.memory_space<vmem>>, vector<16x32xf32>,
    } else {
    }
    return
  }
  func.func @transform_0(%arg0: i32, %arg1: i32, %arg2: i32) -> i32 {
    %c0_i32 = arith.constant 0 : i32
    %c0_i32_0 = arith.constant 0 : i32
    return %c0_i32 : i32
  }
  func.func @transform_1(%arg0: i32, %arg1: i32, %arg2: i32) -> (i32, i32) {
    %c0_i32 = arith.constant 0 : i32
    return %arg0, %arg2 : i32, i32
  }
  func.func @transform_2(%arg0: i32, %arg1: i32, %arg2: i32) -> (i32, i32) {
    %c0_i32 = arith.constant 0 : i32
    return %arg2, %arg1 : i32, i32
  }
  func.func @transform_3(%arg0: i32, %arg1: i32, %arg2: i32) -> (i32, i32) {
    %c0_i32 = arith.constant 0 : i32
    %c0_i32_0 = arith.constant 0 : i32
    return %c0_i32, %arg1 : i32, i32
  }
  func.func @transform_4(%arg0: i32, %arg1: i32, %arg2: i32) -> (i32, i32) {
    %c0_i32 = arith.constant 0 : i32
    return %arg0, %arg1 : i32, i32
  }
  func.func @transform_5(%arg0: i32, %arg1: i32, %arg2: i32) -> (i32, i32) {
    %c0_i32 = arith.constant 0 : i32
    return %arg0, %arg1 : i32, i32
  }
}

module attributes {stable_mosaic.version = 11 : i64} {
  func.func @_qlin_kernel(%arg0: i32, %arg1: i32, %arg2: i32, %arg3: memref<2xf32, #tpu.memory_space<smem>>, %arg4: memref<16x32xf32, #tpu.memory_space<vmem>>, %arg5: memref<32x128xbf16, #tpu.memory_space<vmem>>, %arg6: memref<1x128xf32, #tpu.memory_space<vmem>>, %arg7: memref<16x128xf32, #tpu.memory_space<vmem>>, %arg8: memref<16x128xf32, #tpu.memory_space<vmem>>) attributes {dimension_semantics = [#tpu.dimension_semantics<parallel>, #tpu.dimension_semantics<parallel>, #tpu.dimension_semantics<arbitrary>], iteration_bounds = array<i64: 1, 1, 1>, scalar_prefetch = 0 : i64, scratch_operands = 1 : i64, tpu.core_type = #tpu.core_type<tc>, window_params = [{transform_indices = @transform_0, window_bounds = array<i64: 2>}, {transform_indices = @transform_1, window_bounds = array<i64: 16, 32>}, {transform_indices = @transform_2, window_bounds = array<i64: 32, 128>}, {transform_indices = @transform_3, window_bounds = array<i64: 1, 128>}, {transform_indices = @transform_4, window_bounds = array<i64: 16, 128>}]} {
    %c0_i32 = arith.constant 0 : i32
    %0 = arith.cmpi eq, %arg2, %c0_i32 : i32
    %1 = arith.extui %0 : i1 to i32
    %c0_i32_0 = arith.constant 0 : i32
    %2 = arith.cmpi ne, %1, %c0_i32_0 : i32
    scf.if %2 {
      %cst_11 = arith.constant 0.000000e+00 : f32
      %17 = vector.broadcast %cst_11 : f32 to vector<16x128xf32>
      %c0_12 = arith.constant 0 : index
      %c0_13 = arith.constant 0 : index
      %18 = vector.load %arg8[%c0_12, %c0_13] : memref<16x128xf32, #tpu.memory_space<vmem>>, vector<16x128xf32>
      tpu.vector_store %arg8[%c0_12, %c0_13], %17 {strides = array<i32>} : memref<16x128xf32, #tpu.memory_space<vmem>>, vector<16x128xf32>,
    } else {
    }
    %c0 = arith.constant 0 : index
    %3 = memref.load %arg3[%c0] : memref<2xf32, #tpu.memory_space<smem>>
    %c0_1 = arith.constant 0 : index
    %c0_2 = arith.constant 0 : index
    %4 = vector.load %arg4[%c0_1, %c0_2] : memref<16x32xf32, #tpu.memory_space<vmem>>, vector<16x32xf32>
    %5 = vector.broadcast %3 : f32 to vector<16x32xf32>
    %6 = arith.mulf %4, %5 : vector<16x32xf32>
    %7 = math.roundeven %6 : vector<16x32xf32>
    %8 = arith.truncf %7 : vector<16x32xf32> to vector<16x32xbf16>
    %c0_3 = arith.constant 0 : index
    %c0_4 = arith.constant 0 : index
    %9 = vector.load %arg8[%c0_3, %c0_4] : memref<16x128xf32, #tpu.memory_space<vmem>>, vector<16x128xf32>
    %c0_5 = arith.constant 0 : index
    %c0_6 = arith.constant 0 : index
    %10 = vector.load %arg5[%c0_5, %c0_6] : memref<32x128xbf16, #tpu.memory_space<vmem>>, vector<32x128xbf16>
    %cst = arith.constant dense<0.000000e+00> : vector<16x128xf32>
    %11 = tpu.matmul %8, %10, %cst {dimension_numbers = #tpu.dot_dimension_numbers<[1], [0], [0], [1], [0, 0, 1, 1], [], []>} : vector<16x32xbf16>, vector<32x128xbf16>, vector<16x128xf32> -> vector<16x128xf32>
    %12 = arith.addf %9, %11 : vector<16x128xf32>
    %c0_7 = arith.constant 0 : index
    %c0_8 = arith.constant 0 : index
    %13 = vector.load %arg8[%c0_7, %c0_8] : memref<16x128xf32, #tpu.memory_space<vmem>>, vector<16x128xf32>
    tpu.vector_store %arg8[%c0_7, %c0_8], %12 {strides = array<i32>} : memref<16x128xf32, #tpu.memory_space<vmem>>, vector<16x128xf32>,
    %c0_i32_9 = arith.constant 0 : i32
    %14 = arith.cmpi eq, %arg2, %c0_i32_9 : i32
    %15 = arith.extui %14 : i1 to i32
    %c0_i32_10 = arith.constant 0 : i32
    %16 = arith.cmpi ne, %15, %c0_i32_10 : i32
    scf.if %16 {
      %c0_11 = arith.constant 0 : index
      %c0_12 = arith.constant 0 : index
      %17 = vector.load %arg8[%c0_11, %c0_12] : memref<16x128xf32, #tpu.memory_space<vmem>>, vector<16x128xf32>
      %c0_13 = arith.constant 0 : index
      %c0_14 = arith.constant 0 : index
      %18 = vector.load %arg6[%c0_13, %c0_14] : memref<1x128xf32, #tpu.memory_space<vmem>>, vector<1x128xf32>
      %19 = vector.broadcast %18 : vector<1x128xf32> to vector<16x128xf32>
      %20 = arith.addf %17, %19 : vector<16x128xf32>
      %c1 = arith.constant 1 : index
      %21 = memref.load %arg3[%c1] : memref<2xf32, #tpu.memory_space<smem>>
      %22 = vector.broadcast %21 : f32 to vector<16x128xf32>
      %23 = arith.mulf %20, %22 : vector<16x128xf32>
      %c0_15 = arith.constant 0 : index
      %c0_16 = arith.constant 0 : index
      %24 = vector.load %arg7[%c0_15, %c0_16] : memref<16x128xf32, #tpu.memory_space<vmem>>, vector<16x128xf32>
      tpu.vector_store %arg7[%c0_15, %c0_16], %23 {strides = array<i32>} : memref<16x128xf32, #tpu.memory_space<vmem>>, vector<16x128xf32>,
    } else {
    }
    return
  }
  func.func @transform_0(%arg0: i32, %arg1: i32, %arg2: i32) -> i32 {
    %c0_i32 = arith.constant 0 : i32
    %c0_i32_0 = arith.constant 0 : i32
    return %c0_i32 : i32
  }
  func.func @transform_1(%arg0: i32, %arg1: i32, %arg2: i32) -> (i32, i32) {
    %c0_i32 = arith.constant 0 : i32
    return %arg0, %arg2 : i32, i32
  }
  func.func @transform_2(%arg0: i32, %arg1: i32, %arg2: i32) -> (i32, i32) {
    %c0_i32 = arith.constant 0 : i32
    return %arg2, %arg1 : i32, i32
  }
  func.func @transform_3(%arg0: i32, %arg1: i32, %arg2: i32) -> (i32, i32) {
    %c0_i32 = arith.constant 0 : i32
    %c0_i32_0 = arith.constant 0 : i32
    return %c0_i32, %arg1 : i32, i32
  }
  func.func @transform_4(%arg0: i32, %arg1: i32, %arg2: i32) -> (i32, i32) {
    %c0_i32 = arith.constant 0 : i32
    return %arg0, %arg1 : i32, i32
  }
}

module attributes {stable_mosaic.version = 11 : i64} {
  func.func @_qlin_kernel(%arg0: i32, %arg1: i32, %arg2: i32, %arg3: memref<2xf32, #tpu.memory_space<smem>>, %arg4: memref<16x128xf32, #tpu.memory_space<vmem>>, %arg5: memref<128x32xbf16, #tpu.memory_space<vmem>>, %arg6: memref<1x32xf32, #tpu.memory_space<vmem>>, %arg7: memref<16x32xf32, #tpu.memory_space<vmem>>, %arg8: memref<16x32xf32, #tpu.memory_space<vmem>>, %arg9: memref<16x32xf32, #tpu.memory_space<vmem>>) attributes {dimension_semantics = [#tpu.dimension_semantics<parallel>, #tpu.dimension_semantics<parallel>, #tpu.dimension_semantics<arbitrary>], iteration_bounds = array<i64: 1, 1, 1>, scalar_prefetch = 0 : i64, scratch_operands = 1 : i64, tpu.core_type = #tpu.core_type<tc>, window_params = [{transform_indices = @transform_0, window_bounds = array<i64: 2>}, {transform_indices = @transform_1, window_bounds = array<i64: 16, 128>}, {transform_indices = @transform_2, window_bounds = array<i64: 128, 32>}, {transform_indices = @transform_3, window_bounds = array<i64: 1, 32>}, {transform_indices = @transform_4, window_bounds = array<i64: 16, 32>}, {transform_indices = @transform_5, window_bounds = array<i64: 16, 32>}]} {
    %c0_i32 = arith.constant 0 : i32
    %0 = arith.cmpi eq, %arg2, %c0_i32 : i32
    %1 = arith.extui %0 : i1 to i32
    %c0_i32_0 = arith.constant 0 : i32
    %2 = arith.cmpi ne, %1, %c0_i32_0 : i32
    scf.if %2 {
      %cst_11 = arith.constant 0.000000e+00 : f32
      %17 = vector.broadcast %cst_11 : f32 to vector<16x32xf32>
      %c0_12 = arith.constant 0 : index
      %c0_13 = arith.constant 0 : index
      %18 = vector.load %arg9[%c0_12, %c0_13] : memref<16x32xf32, #tpu.memory_space<vmem>>, vector<16x32xf32>
      tpu.vector_store %arg9[%c0_12, %c0_13], %17 {strides = array<i32>} : memref<16x32xf32, #tpu.memory_space<vmem>>, vector<16x32xf32>,
    } else {
    }
    %c0 = arith.constant 0 : index
    %3 = memref.load %arg3[%c0] : memref<2xf32, #tpu.memory_space<smem>>
    %c0_1 = arith.constant 0 : index
    %c0_2 = arith.constant 0 : index
    %4 = vector.load %arg4[%c0_1, %c0_2] : memref<16x128xf32, #tpu.memory_space<vmem>>, vector<16x128xf32>
    %5 = vector.broadcast %3 : f32 to vector<16x128xf32>
    %6 = arith.mulf %4, %5 : vector<16x128xf32>
    %7 = math.roundeven %6 : vector<16x128xf32>
    %8 = arith.truncf %7 : vector<16x128xf32> to vector<16x128xbf16>
    %c0_3 = arith.constant 0 : index
    %c0_4 = arith.constant 0 : index
    %9 = vector.load %arg9[%c0_3, %c0_4] : memref<16x32xf32, #tpu.memory_space<vmem>>, vector<16x32xf32>
    %c0_5 = arith.constant 0 : index
    %c0_6 = arith.constant 0 : index
    %10 = vector.load %arg5[%c0_5, %c0_6] : memref<128x32xbf16, #tpu.memory_space<vmem>>, vector<128x32xbf16>
    %cst = arith.constant dense<0.000000e+00> : vector<16x32xf32>
    %11 = tpu.matmul %8, %10, %cst {dimension_numbers = #tpu.dot_dimension_numbers<[1], [0], [0], [1], [0, 0, 1, 1], [], []>} : vector<16x128xbf16>, vector<128x32xbf16>, vector<16x32xf32> -> vector<16x32xf32>
    %12 = arith.addf %9, %11 : vector<16x32xf32>
    %c0_7 = arith.constant 0 : index
    %c0_8 = arith.constant 0 : index
    %13 = vector.load %arg9[%c0_7, %c0_8] : memref<16x32xf32, #tpu.memory_space<vmem>>, vector<16x32xf32>
    tpu.vector_store %arg9[%c0_7, %c0_8], %12 {strides = array<i32>} : memref<16x32xf32, #tpu.memory_space<vmem>>, vector<16x32xf32>,
    %c0_i32_9 = arith.constant 0 : i32
    %14 = arith.cmpi eq, %arg2, %c0_i32_9 : i32
    %15 = arith.extui %14 : i1 to i32
    %c0_i32_10 = arith.constant 0 : i32
    %16 = arith.cmpi ne, %15, %c0_i32_10 : i32
    scf.if %16 {
      %c0_11 = arith.constant 0 : index
      %c0_12 = arith.constant 0 : index
      %17 = vector.load %arg9[%c0_11, %c0_12] : memref<16x32xf32, #tpu.memory_space<vmem>>, vector<16x32xf32>
      %c0_13 = arith.constant 0 : index
      %c0_14 = arith.constant 0 : index
      %18 = vector.load %arg6[%c0_13, %c0_14] : memref<1x32xf32, #tpu.memory_space<vmem>>, vector<1x32xf32>
      %19 = vector.broadcast %18 : vector<1x32xf32> to vector<16x32xf32>
      %20 = arith.addf %17, %19 : vector<16x32xf32>
      %c1 = arith.constant 1 : index
      %21 = memref.load %arg3[%c1] : memref<2xf32, #tpu.memory_space<smem>>
      %22 = vector.broadcast %21 : f32 to vector<16x32xf32>
      %23 = arith.mulf %20, %22 : vector<16x32xf32>
      %c0_15 = arith.constant 0 : index
      %c0_16 = arith.constant 0 : index
      %24 = vector.load %arg7[%c0_15, %c0_16] : memref<16x32xf32, #tpu.memory_space<vmem>>, vector<16x32xf32>
      %25 = arith.addf %23, %24 : vector<16x32xf32>
      %c0_17 = arith.constant 0 : index
      %c0_18 = arith.constant 0 : index
      %26 = vector.load %arg8[%c0_17, %c0_18] : memref<16x32xf32, #tpu.memory_space<vmem>>, vector<16x32xf32>
      tpu.vector_store %arg8[%c0_17, %c0_18], %25 {strides = array<i32>} : memref<16x32xf32, #tpu.memory_space<vmem>>, vector<16x32xf32>,
    } else {
    }
    return
  }
  func.func @transform_0(%arg0: i32, %arg1: i32, %arg2: i32) -> i32 {
    %c0_i32 = arith.constant 0 : i32
    %c0_i32_0 = arith.constant 0 : i32
    return %c0_i32 : i32
  }
  func.func @transform_1(%arg0: i32, %arg1: i32, %arg2: i32) -> (i32, i32) {
    %c0_i32 = arith.constant 0 : i32
    return %arg0, %arg2 : i32, i32
  }
  func.func @transform_2(%arg0: i32, %arg1: i32, %arg2: i32) -> (i32, i32) {
    %c0_i32 = arith.constant 0 : i32
    return %arg2, %arg1 : i32, i32
  }
  func.func @transform_3(%arg0: i32, %arg1: i32, %arg2: i32) -> (i32, i32) {
    %c0_i32 = arith.constant 0 : i32
    %c0_i32_0 = arith.constant 0 : i32
    return %c0_i32, %arg1 : i32, i32
  }
  func.func @transform_4(%arg0: i32, %arg1: i32, %arg2: i32) -> (i32, i32) {
    %c0_i32 = arith.constant 0 : i32
    return %arg0, %arg1 : i32, i32
  }
  func.func @transform_5(%arg0: i32, %arg1: i32, %arg2: i32) -> (i32, i32) {
    %c0_i32 = arith.constant 0 : i32
    return %arg0, %arg1 : i32, i32
  }
}

</mosaic_0001>

<bundles_post_ra>
// kernel: q_block_forward.7
= control target key start
LH: loop header
LB: loop body
LE: loop exit
PB: predicated region body
PF: predicated region fallthrough
CT: control target
= control target key end

     0   :  { %vm16_vm0 = vcmask 261120   ;;  %v95_v4 = vmov 32.0   ;;  %s140_s0 = inlined_call_operand.vmem [shape: f32[16,32], index: 0, kind: input, shape index: {}]   ;;  %s141_s1 = inlined_call_operand.vmem [shape: f32[1,32], index: 1, kind: input, shape index: {}]   ;;  %s142_s2 = inlined_call_operand.vmem [shape: f32[1,32], index: 2, kind: input, shape index: {}]   ;;  %s143_s3 = inlined_call_operand.vmem [shape: f32[16,32], index: 3, kind: output, shape index: {}]  }
   0x1   :  { %v14_v0 = vld [vmem:[%s140_s0] sm:$0xff]  ;;  %v15_v2 = vld [vmem:[%s140_s0 + $0x8] sm:$0xff]  ;;  %89 = vrcp.f32 %v95_v4 }
   0x2   :  { %v17_v1 = vsel %vm16_vm0, %v14_v0, 0.0  ;;  %v20_v3 = vsel %vm16_vm0, %v15_v2, 0.0  ;;  %v87_v35 = vld [vmem:[%s141_s1] ss:$0 sm:$0xff] }
   0x3   :  { %18 = vadd.xlane.f32.xlu0 %v17_v1  ;;  %v88_v38 = vld [vmem:[%s142_s2] ss:$0 sm:$0xff] }
   0x7   :  { %v90_v5 = vpop.eup %89 }
   0x8   :  { %v24_v6 = vmul.f32 32.0, %v90_v5  ;;  %vm28_vm1 = vweird.f32 %v90_v5 }
   0xa   :  { %v25_v7 = vsub.f32 1.0, %v24_v6 }
   0xb   :  { %21 = vadd.xlane.f32.xlu0 %v20_v3 }
   0xc   :  { %v26_v8 = vmul.f32 %v90_v5, %v25_v7 }
   0xe   :  { %v27_v9 = vadd.f32 %v90_v5, %v26_v8 }
  0x10   :  { %v29_v10 = vsel %vm28_vm1, %v90_v5, %v27_v9 }
  0x76   :  { %v19_v11 = vpop.xlane.xlu0 %18 }
  0x77   :  { %v30_v12 = vmul.f32 %v29_v10, %v19_v11 }
  0x79   :  { %v32_v13 = vsub.f32 %v14_v0, %v30_v12 }
  0x7b   :  { %v34_v14 = vmul.f32 %v32_v13, %v32_v13 }
  0x7d   :  { %v36_v15 = vsel %vm16_vm0, %v34_v14, 0.0 }
  0x7e   :  { %37 = vadd.xlane.f32.xlu1 %v36_v15  ;;  %v22_v16 = vpop.xlane.xlu0 %21 }
  0x7f   :  { %v31_v17 = vmul.f32 %v29_v10, %v22_v16 }
  0x81   :  { %v33_v18 = vsub.f32 %v15_v2, %v31_v17 }
  0x83   :  { %v35_v19 = vmul.f32 %v33_v18, %v33_v18 }
  0x85   :  { %v39_v20 = vsel %vm16_vm0, %v35_v19, 0.0 }
  0x86   :  { %40 = vadd.xlane.f32.xlu1 %v39_v20 }
  0xf1   :  { %v38_v21 = vpop.xlane.xlu1 %37 }
  0xf2   :  { %v42_v22 = vmul.f32 %v38_v21, %v29_v10 }
  0xf4   :  { %v44_v23 = vadd.f32 1e-05, %v42_v22 }
  0xf6   :  { %91 = vrsqrt.f32 %v44_v23  ;;  %vm52_vm3 = vweird.f32 %v44_v23 }
  0xf9   :  { %v41_v24 = vpop.xlane.xlu1 %40 }
  0xfa   :  { %v43_v25 = vmul.f32 %v41_v24, %v29_v10 }
  0xfc   :  { %v92_v26 = vpop.eup %91  ;;  %v45_v27 = vadd.f32 1e-05, %v43_v25 }
  0xfd   :  { %v47_v28 = vmul.f32 %v92_v26, %v44_v23  ;;  %vm53_vm2 = vweird.f32 %v92_v26 }
  0xfe   :  { %93 = vrsqrt.f32 %v45_v27  ;;  %vm54_vm4 = vmor %vm52_vm3, %vm53_vm2  ;;  %vm62_vm6 = vweird.f32 %v45_v27 }
  0xff   :  { %v48_v29 = vmul.f32 %v92_v26, %v47_v28 }
 0x101   :  { %v49_v30 = vmul.f32 0.5, %v48_v29 }
 0x103   :  { %v50_v31 = vsub.f32 1.5, %v49_v30 }
 0x104   :  { %v94_v32 = vpop.eup %93 }
 0x105   :  { %v51_v33 = vmul.f32 %v92_v26, %v50_v31  ;;  %v57_v34 = vmul.f32 %v94_v32, %v45_v27  ;;  %vm63_vm5 = vweird.f32 %v94_v32 }
 0x106   :  { %vm64_vm7 = vmor %vm62_vm6, %vm63_vm5 }
 0x107   :  { %v55_v36 = vsel %vm54_vm4, %v92_v26, %v51_v33  ;;  %v58_v37 = vmul.f32 %v94_v32, %v57_v34 }
 0x108   :  { %v66_v39 = vmul.f32 %v55_v36, %v32_v13 }
 0x109   :  { %v59_v40 = vmul.f32 0.5, %v58_v37 }
 0x10a   :  { %v72_v41 = vmul.f32 %v87_v35, %v66_v39 }
 0x10b   :  { %v60_v42 = vsub.f32 1.5, %v59_v40 }
 0x10c   :  { %v78_v43 = vadd.f32 %v88_v38, %v72_v41 }
 0x10d   :  { %v61_v44 = vmul.f32 %v94_v32, %v60_v42 }
 0x10e   :  { %80 = vst.msk [vmem:[%s143_s3] sm:$0xff] %vm16_vm0, %v78_v43 }
 0x10f   :  { %v65_v45 = vsel %vm64_vm7, %v94_v32, %v61_v44 }
 0x110   :  { %v67_v46 = vmul.f32 %v65_v45, %v33_v18 }
 0x112   :  { %v73_v47 = vmul.f32 %v87_v35, %v67_v46 }
 0x114   :  { %v79_v48 = vadd.f32 %v88_v38, %v73_v47 }
 0x116   :  { %81 = vst.msk [vmem:[%s143_s3 + $0x8] sm:$0xff] %vm16_vm0, %v79_v48 }

// kernel: q_block_forward.8
= control target key start
LH: loop header
LB: loop body
LE: loop exit
PB: predicated region body
PF: predicated region fallthrough
CT: control target
= control target key end

     0   :  { %9 = vsyncpa [#allocation4], 0  ;;  %s155_s18 = smov [#allocation3]   ;;  %s212_s0 = inlined_call_operand.vmem [shape: f32[2], index: 0, kind: input, shape index: {}]   ;;  %s213_s1 = inlined_call_operand.vmem [shape: f32[16,32], index: 1, kind: input, shape index: {}]   ;;  %s214_s2 = inlined_call_operand.vmem [shape: bf16[32,96], index: 2, kind: input, shape index: {}]   ;;  %s215_s3 = inlined_call_operand.vmem [shape: f32[1,96], index: 3, kind: input, shape index: {}]   ;;  %s216_s4 = inlined_call_operand.vmem [shape: f32[16,96], index: 4, kind: output, shape index: {}]  }
   0x1   :  { %s15_s17 = sshll.u32 %s212_s0, 4  ;;  %s16_s17 = int_to_ptr.vmem [resolvable:$true] %s15_s17 }
   0x2   :  { %18 = dma.vmem_to_smem %s16_s17, 16, %s155_s18, [#allocation4]  }
   0x3   :  { %153 = dma.done.wait [#allocation4], 16  }
   0x4   :  { %154 = vsyncadd [#allocation4], 4294967280 }
   0x5   :  { %29 = sfence }
   0x6   :  { %v121_v0 = vld [vmem:[%s214_s2 + $0x8] sm:$0xff]  ;;  %s38_s21 = sld [smem:[#allocation3]]  ;;  %vm35_vm0 = vcmask 785408   ;;  %v120_v1 = vld [vmem:[%s214_s2] sm:$0xff]  ;;  %v156_v2 = vmov 0.0   ;;  %vm65_vm3 = vcmask 261120  }
   0x7   :  { %75 = vmatpush.bf16.msra.mxu0 %v121_v0  ;;  %36 = vst.msk [vmem:[#allocation2] sm:$0xff] %vm35_vm0, %v156_v2  ;;  %v39_v3 = vld [vmem:[%s213_s1] sm:$0xff]  ;;  %v40_v4 = vld [vmem:[%s213_s1 + $0x8] sm:$0xff]  ;;  %s119_s1 = sld [smem:[#allocation3 + $0x1]] }
   0x8   :  { %37 = vst.msk [vmem:[#allocation2 + $0x8] sm:$0xff] %vm35_vm0, %v156_v2  ;;  %v140_v27 = vld [vmem:[%s215_s3] ss:$0 sm:$0xff] }
   0xb   :  { %76 = vmatpush.bf16.msra.mxu0 %v120_v1 }
   0xc   :  { %v41_v5 = vstv %s38_s21 }
   0xd   :  { %v42_v6 = vmul.f32 %v41_v5, %v39_v3  ;;  %v43_v7 = vmul.f32 %v41_v5, %v40_v4  ;;  %v100_v31 = vstv %s119_s1 }
   0xe   :  { %v47_v23 = vld [vmem:[#allocation2] sm:$0xff] }
   0xf   :  { %v124_v8 = vcvt.f32.s32 %v42_v6  ;;  %v122_v9 = vand.u32 2147483647, %v42_v6  ;;  %v132_v10 = vcvt.f32.s32 %v43_v7  ;;  %v127_v12 = vand.u32 2147483648, %v42_v6  ;;  %v48_v26 = vld [vmem:[#allocation2 + $0x8] sm:$0xff] }
  0x10   :  { %v130_v13 = vand.u32 2147483647, %v43_v7  ;;  %v135_v15 = vand.u32 2147483648, %v43_v7 }
  0x11   :  { %v125_v11 = vcvt.s32.f32 %v124_v8  ;;  %v133_v14 = vcvt.s32.f32 %v132_v10  ;;  %vm123_vm1 = vcmp.lt.f32.partialorder %v122_v9, 8388608.0 }
  0x12   :  { %vm131_vm2 = vcmp.lt.f32.partialorder %v130_v13, 8388608.0 }
  0x13   :  { %v126_v16 = vand.u32 2147483647, %v125_v11  ;;  %v134_v17 = vand.u32 2147483647, %v133_v14 }
  0x15   :  { %v128_v18 = vor.u32 %v127_v12, %v126_v16  ;;  %v136_v19 = vor.u32 %v135_v15, %v134_v17 }
  0x17   :  { %v129_v20 = vsel %vm123_vm1, %v128_v18, %v42_v6  ;;  %v137_v21 = vsel %vm131_vm2, %v136_v19, %v43_v7 }
  0x18   :  { %v46_v22 = vpack.c.bf16 %v137_v21, %v129_v20 }
  0x1a   :  { %118 = vmatmul.msk.bf16.vlgmr.msra.gmra.mxu0 %vm65_vm3, %v46_v22 }
  0x97   :  { %v78_v24 = vpop.f32.mrf.mxu0 }
  0x98   :  { %v83_v25 = vadd.f32 %v78_v24, %v47_v23 }
  0x9a   :  { %86 = vst.msk [vmem:[#allocation2] sm:$0xff] %vm35_vm0, %v83_v25 }
  0x9f   :  { %v80_v28 = vpop.f32.mrf.mxu0 }
  0xa0   :  { %v84_v29 = vadd.f32 %v80_v28, %v48_v26 }
  0xa1   :  { %v91_v30 = vld [vmem:[#allocation2] sm:$0xff] }
  0xa2   :  { %v97_v32 = vadd.f32 %v140_v27, %v91_v30  ;;  %87 = vst.msk [vmem:[#allocation2 + $0x8] sm:$0xff] %vm35_vm0, %v84_v29 }
  0xa4   :  { %v101_v33 = vmul.f32 %v100_v31, %v97_v32 }
  0xa6   :  { %103 = vst.msk [vmem:[%s216_s4] sm:$0xff] %vm35_vm0, %v101_v33 }
  0xa9   :  { %v92_v34 = vld [vmem:[#allocation2 + $0x8] sm:$0xff] }
  0xaa   :  { %v98_v35 = vadd.f32 %v140_v27, %v92_v34 }
  0xac   :  { %v102_v36 = vmul.f32 %v100_v31, %v98_v35 }
  0xae   :  { %104 = vst.msk [vmem:[%s216_s4 + $0x8] sm:$0xff] %vm35_vm0, %v102_v36 }
  0xaf   :  { %109 = vsyncpa [#allocation4], 1 }

// kernel: q_block_forward.10
= control target key start
LH: loop header
LB: loop body
LE: loop exit
PB: predicated region body
PF: predicated region fallthrough
CT: control target
= control target key end

     0   :  { %10 = vsyncpa [#allocation4], 0  ;;  %s161_s21 = smov [#allocation3]   ;;  %s230_s0 = inlined_call_operand.vmem [shape: f32[2], index: 0, kind: input, shape index: {}]   ;;  %s231_s1 = inlined_call_operand.vmem [shape: f32[16,32], index: 1, kind: input, shape index: {}]   ;;  %s232_s2 = inlined_call_operand.vmem [shape: bf16[32,32], index: 2, kind: input, shape index: {}]   ;;  %s233_s3 = inlined_call_operand.vmem [shape: f32[1,32], index: 3, kind: input, shape index: {}]   ;;  %s234_s4 = inlined_call_operand.vmem [shape: f32[16,32], index: 4, kind: input, shape index: {}]   ;;  %s235_s5 = inlined_call_operand.vmem [shape: f32[16,32], index: 5, kind: output, shape index: {}]  }
   0x1   :  { %s16_s20 = sshll.u32 %s230_s0, 4  ;;  %s17_s20 = int_to_ptr.vmem [resolvable:$true] %s16_s20 }
   0x2   :  { %19 = dma.vmem_to_smem %s17_s20, 16, %s161_s21, [#allocation4]  }
   0x3   :  { %159 = dma.done.wait [#allocation4], 16  }
   0x4   :  { %160 = vsyncadd [#allocation4], 4294967280 }
   0x5   :  { %32 = sfence }
   0x6   :  { %v127_v0 = vld [vmem:[%s232_s2 + $0x8] sm:$0xff]  ;;  %s41_s24 = sld [smem:[#allocation3]]  ;;  %vm38_vm0 = vcmask 261120   ;;  %v126_v1 = vld [vmem:[%s232_s2] sm:$0xff]  ;;  %v162_v2 = vmov 0.0  }
   0x7   :  { %78 = vmatpush.bf16.msra.mxu0 %v127_v0  ;;  %39 = vst.msk [vmem:[#allocation2] sm:$0xff] %vm38_vm0, %v162_v2  ;;  %v42_v3 = vld [vmem:[%s231_s1] sm:$0xff]  ;;  %v43_v4 = vld [vmem:[%s231_s1 + $0x8] sm:$0xff]  ;;  %s125_s1 = sld [smem:[#allocation3 + $0x1]] }
   0x8   :  { %40 = vst.msk [vmem:[#allocation2 + $0x8] sm:$0xff] %vm38_vm0, %v162_v2  ;;  %v146_v27 = vld [vmem:[%s233_s3] ss:$0 sm:$0xff]  ;;  %v106_v38 = vld [vmem:[%s234_s4 + $0x8] sm:$0xff] }
   0x9   :  { %v105_v33 = vld [vmem:[%s234_s4] sm:$0xff] }
   0xb   :  { %79 = vmatpush.bf16.msra.mxu0 %v126_v1 }
   0xc   :  { %v44_v5 = vstv %s41_s24 }
   0xd   :  { %v45_v6 = vmul.f32 %v44_v5, %v42_v3  ;;  %v46_v7 = vmul.f32 %v44_v5, %v43_v4  ;;  %v102_v31 = vstv %s125_s1 }
   0xe   :  { %v50_v23 = vld [vmem:[#allocation2] sm:$0xff] }
   0xf   :  { %v130_v8 = vcvt.f32.s32 %v45_v6  ;;  %v128_v9 = vand.u32 2147483647, %v45_v6  ;;  %v138_v10 = vcvt.f32.s32 %v46_v7  ;;  %v133_v12 = vand.u32 2147483648, %v45_v6  ;;  %v51_v26 = vld [vmem:[#allocation2 + $0x8] sm:$0xff] }
  0x10   :  { %v136_v13 = vand.u32 2147483647, %v46_v7  ;;  %v141_v15 = vand.u32 2147483648, %v46_v7 }
  0x11   :  { %v131_v11 = vcvt.s32.f32 %v130_v8  ;;  %v139_v14 = vcvt.s32.f32 %v138_v10  ;;  %vm129_vm1 = vcmp.lt.f32.partialorder %v128_v9, 8388608.0 }
  0x12   :  { %vm137_vm2 = vcmp.lt.f32.partialorder %v136_v13, 8388608.0 }
  0x13   :  { %v132_v16 = vand.u32 2147483647, %v131_v11  ;;  %v140_v17 = vand.u32 2147483647, %v139_v14 }
  0x15   :  { %v134_v18 = vor.u32 %v133_v12, %v132_v16  ;;  %v142_v19 = vor.u32 %v141_v15, %v140_v17 }
  0x17   :  { %v135_v20 = vsel %vm129_vm1, %v134_v18, %v45_v6  ;;  %v143_v21 = vsel %vm137_vm2, %v142_v19, %v46_v7 }
  0x18   :  { %v49_v22 = vpack.c.bf16 %v143_v21, %v135_v20 }
  0x1a   :  { %124 = vmatmul.msk.bf16.vlgmr.msra.gmra.mxu0 %vm38_vm0, %v49_v22 }
  0x97   :  { %v81_v24 = vpop.f32.mrf.mxu0 }
  0x98   :  { %v86_v25 = vadd.f32 %v81_v24, %v50_v23 }
  0x9a   :  { %88 = vst.msk [vmem:[#allocation2] sm:$0xff] %vm38_vm0, %v86_v25 }
  0x9f   :  { %v83_v28 = vpop.f32.mrf.mxu0 }
  0xa0   :  { %v87_v29 = vadd.f32 %v83_v28, %v51_v26 }
  0xa1   :  { %v93_v30 = vld [vmem:[#allocation2] sm:$0xff] }
  0xa2   :  { %v99_v32 = vadd.f32 %v146_v27, %v93_v30  ;;  %89 = vst.msk [vmem:[#allocation2 + $0x8] sm:$0xff] %vm38_vm0, %v87_v29 }
  0xa4   :  { %v103_v34 = vmul.f32 %v102_v31, %v99_v32 }
  0xa6   :  { %v107_v35 = vadd.f32 %v105_v33, %v103_v34 }
  0xa8   :  { %109 = vst.msk [vmem:[%s235_s5] sm:$0xff] %vm38_vm0, %v107_v35 }
  0xa9   :  { %v94_v36 = vld [vmem:[#allocation2 + $0x8] sm:$0xff] }
  0xaa   :  { %v100_v37 = vadd.f32 %v146_v27, %v94_v36 }
  0xac   :  { %v104_v39 = vmul.f32 %v102_v31, %v100_v37 }
  0xae   :  { %v108_v40 = vadd.f32 %v106_v38, %v104_v39 }
  0xb0   :  { %110 = vst.msk [vmem:[%s235_s5 + $0x8] sm:$0xff] %vm38_vm0, %v108_v40 }
  0xb1   :  { %115 = vsyncpa [#allocation4], 1 }

// kernel: q_block_forward.9
= control target key start
LH: loop header
LB: loop body
LE: loop exit
PB: predicated region body
PF: predicated region fallthrough
CT: control target
= control target key end

     0   :  { %vm52_vm0 = vcmask 64512   ;;  %v1053_v32 = vmov 8.0   ;;  %s1817_s1 = inlined_call_operand.vmem [shape: f32[8,8,8], index: 1, kind: input, shape index: {}]   ;;  %s1818_s0 = inlined_call_operand.vmem [shape: f32[8,8,8], index: 0, kind: input, shape index: {}]   ;;  %s1819_s5 = inlined_call_operand.vmem [shape: f32[1,1,8], index: 5, kind: input, shape index: {}]   ;;  %s1820_s6 = inlined_call_operand.vmem [shape: f32[1,1,8], index: 6, kind: input, shape index: {}]   ;;  %s1821_s3 = inlined_call_operand.vmem [shape: f32[1,1,8], index: 3, kind: input, shape index: {}]   ;;  %s1822_s4 = inlined_call_operand.vmem [shape: f32[1,1,8], index: 4, kind: input, shape index: {}]   ;;  %s1823_s2 = inlined_call_operand.vmem [shape: f32[8,8,8], index: 2, kind: input, shape index: {}]   ;;  %s1824_s7 = inlined_call_operand.vmem [shape: f32[8,8,8], index: 7, kind: output, shape index: {}]  }
   0x1   :  { %v1097_v0 = vld [vmem:[%s1817_s1 + $0x30] sm:$0xff]  ;;  %v1112_v6 = vld [vmem:[%s1817_s1 + $0x38] sm:$0xff]  ;;  %v1133_v12 = vld [vmem:[%s1817_s1] sm:$0xff]  ;;  %987 = vrcp.f32 %v1053_v32 }
   0x2   :  { %v36_v1 = vld [vmem:[%s1817_s1 + $0x10] sm:$0xff]  ;;  %v286_v3 = vsel %vm52_vm0, %v1097_v0, 0.0  ;;  %v1117_v7 = vld [vmem:[%s1817_s1 + $0x18] sm:$0xff]  ;;  %v289_v9 = vsel %vm52_vm0, %v1112_v6, 0.0  ;;  %v268_v15 = vsel %vm52_vm0, %v1133_v12, 0.0  ;;  %v1154_v18 = vld [vmem:[%s1817_s1 + $0x8] sm:$0xff] }
   0x3   :  { %v28_v2 = vld [vmem:[%s1818_s0 + $0x10] sm:$0xff]  ;;  %v274_v4 = vsel %vm52_vm0, %v36_v1, 0.0  ;;  %287 = vadd.xlane.f32.xlu2 %v286_v3  ;;  %v1122_v8 = vld [vmem:[%s1818_s0 + $0x18] sm:$0xff]  ;;  %v277_v10 = vsel %vm52_vm0, %v1117_v7, 0.0  ;;  %v1159_v19 = vld [vmem:[%s1818_s0 + $0x8] sm:$0xff]  ;;  %v271_v21 = vsel %vm52_vm0, %v1154_v18, 0.0 }
   0x4   :  { %v59_v5 = vsel %vm52_vm0, %v28_v2, 0.0  ;;  %275 = vadd.xlane.f32.xlu0 %v274_v4  ;;  %v62_v11 = vsel %vm52_vm0, %v1122_v8, 0.0  ;;  %v1138_v13 = vld [vmem:[%s1818_s0 + $0x30] sm:$0xff]  ;;  %v1143_v14 = vld [vmem:[%s1818_s0 + $0x38] sm:$0xff]  ;;  %v1164_v20 = vld [vmem:[%s1818_s0] sm:$0xff]  ;;  %v56_v22 = vsel %vm52_vm0, %v1159_v19, 0.0 }
   0x5   :  { %60 = vadd.xlane.f32.xlu1 %v59_v5  ;;  %v71_v16 = vsel %vm52_vm0, %v1138_v13, 0.0  ;;  %v74_v17 = vsel %vm52_vm0, %v1143_v14, 0.0  ;;  %v53_v23 = vsel %vm52_vm0, %v1164_v20, 0.0  ;;  %v1175_v24 = vld [vmem:[%s1817_s1 + $0x20] sm:$0xff]  ;;  %v1185_v26 = vld [vmem:[%s1817_s1 + $0x28] sm:$0xff] }
   0x6   :  { %v1180_v25 = vld [vmem:[%s1818_s0 + $0x20] sm:$0xff]  ;;  %v280_v27 = vsel %vm52_vm0, %v1175_v24, 0.0  ;;  %v283_v29 = vsel %vm52_vm0, %v1185_v26, 0.0  ;;  %v1196_v30 = vld [vmem:[%s1818_s0 + $0x28] sm:$0xff] }
   0x7   :  { %v65_v28 = vsel %vm52_vm0, %v1180_v25, 0.0  ;;  %v68_v31 = vsel %vm52_vm0, %v1196_v30, 0.0  ;;  %v988_v33 = vpop.eup %987 }
   0x8   :  { %v78_v34 = vmul.f32 8.0, %v988_v33  ;;  %vm82_vm1 = vweird.f32 %v988_v33 }
   0xa   :  { %v79_v35 = vsub.f32 1.0, %v78_v34 }
   0xb   :  { %290 = vadd.xlane.f32.xlu2 %v289_v9 }
   0xc   :  { %278 = vadd.xlane.f32.xlu0 %v277_v10  ;;  %v80_v36 = vmul.f32 %v988_v33, %v79_v35 }
   0xd   :  { %63 = vadd.xlane.f32.xlu1 %v62_v11 }
   0xe   :  { %v81_v37 = vadd.f32 %v988_v33, %v80_v36 }
  0x10   :  { %v1200_v38 = vsel %vm82_vm1, %v988_v33, %v81_v37 }
  0x13   :  { %269 = vadd.xlane.f32.xlu2 %v268_v15 }
  0x14   :  { %72 = vadd.xlane.f32.xlu0 %v71_v16 }
  0x15   :  { %75 = vadd.xlane.f32.xlu1 %v74_v17 }
  0x1b   :  { %57 = vadd.xlane.f32.xlu2 %v56_v22 }
  0x1c   :  { %272 = vadd.xlane.f32.xlu0 %v271_v21 }
  0x1d   :  { %54 = vadd.xlane.f32.xlu1 %v53_v23 }
  0x23   :  { %66 = vadd.xlane.f32.xlu2 %v65_v28 }
  0x24   :  { %281 = vadd.xlane.f32.xlu0 %v280_v27 }
  0x25   :  { %284 = vadd.xlane.f32.xlu1 %v283_v29 }
  0x2c   :  { %69 = vadd.xlane.f32.xlu0 %v68_v31 }
  0x76   :  { %v288_v39 = vpop.xlane.xlu2 %287 }
  0x77   :  { %v276_v40 = vpop.xlane.xlu0 %275  ;;  %v298_v56 = vmul.f32 %v288_v39, %v1200_v38 }
  0x78   :  { %v294_v41 = vmul.f32 %v276_v40, %v1200_v38  ;;  %v61_v42 = vpop.xlane.xlu1 %60 }
  0x79   :  { %v86_v43 = vmul.f32 %v1200_v38, %v61_v42  ;;  %v1234_v63 = vsub.f32 %v1097_v0, %v298_v56 }
  0x7a   :  { %v1204_v44 = vsub.f32 %v36_v1, %v294_v41 }
  0x7b   :  { %v1206_v45 = vsub.f32 %v28_v2, %v86_v43  ;;  %v314_v11 = vmul.f32 %v1234_v63, %v1234_v63 }
  0x7c   :  { %v310_v46 = vmul.f32 %v1204_v44, %v1204_v44 }
  0x7d   :  { %v102_v47 = vmul.f32 %v1206_v45, %v1206_v45 }
  0x7e   :  { %v322_v48 = vsel %vm52_vm0, %v310_v46, 0.0  ;;  %v291_v49 = vpop.xlane.xlu2 %290 }
  0x7f   :  { %v279_v50 = vpop.xlane.xlu0 %278  ;;  %v114_v51 = vsel %vm52_vm0, %v102_v47, 0.0  ;;  %323 = vadd.xlane.f32.xlu1 %v322_v48  ;;  %v299_v52 = vmul.f32 %v291_v49, %v1200_v38 }
  0x80   :  { %v295_v53 = vmul.f32 %v279_v50, %v1200_v38  ;;  %115 = vadd.xlane.f32.xlu0 %v114_v51  ;;  %v64_v54 = vpop.xlane.xlu1 %63 }
  0x81   :  { %v87_v55 = vmul.f32 %v1200_v38, %v64_v54  ;;  %v1219_v57 = vsub.f32 %v1112_v6, %v299_v52 }
  0x82   :  { %v1222_v58 = vsub.f32 %v1117_v7, %v295_v53 }
  0x83   :  { %v1225_v59 = vsub.f32 %v1122_v8, %v87_v55  ;;  %v315_v60 = vmul.f32 %v1219_v57, %v1219_v57 }
  0x84   :  { %v311_v61 = vmul.f32 %v1222_v58, %v1222_v58 }
  0x85   :  { %v103_v62 = vmul.f32 %v1225_v59, %v1225_v59  ;;  %v337_v1 = vsel %vm52_vm0, %v315_v60, 0.0 }
  0x86   :  { %v325_v2 = vsel %vm52_vm0, %v311_v61, 0.0  ;;  %v270_v3 = vpop.xlane.xlu2 %269 }
  0x87   :  { %v73_v4 = vpop.xlane.xlu0 %72  ;;  %326 = vadd.xlane.f32.xlu2 %v325_v2  ;;  %v117_v5 = vsel %vm52_vm0, %v103_v62, 0.0  ;;  %v292_v6 = vmul.f32 %v270_v3, %v1200_v38 }
  0x88   :  { %v90_v7 = vmul.f32 %v1200_v38, %v73_v4  ;;  %338 = vadd.xlane.f32.xlu0 %v337_v1  ;;  %118 = vadd.xlane.f32.xlu1 %v117_v5  ;;  %v76_v8 = vpop.xlane.xlu1 %75 }
  0x89   :  { %v91_v9 = vmul.f32 %v1200_v38, %v76_v8  ;;  %v1243_v0 = vsub.f32 %v1133_v12, %v292_v6  ;;  %v334_v12 = vsel %vm52_vm0, %v314_v11, 0.0 }
  0x8a   :  { %v1246_v10 = vsub.f32 %v1138_v13, %v90_v7 }
  0x8b   :  { %v308_v15 = vmul.f32 %v1243_v0, %v1243_v0  ;;  %v1253_v16 = vsub.f32 %v1143_v14, %v91_v9 }
  0x8c   :  { %v106_v17 = vmul.f32 %v1246_v10, %v1246_v10 }
  0x8d   :  { %v316_v21 = vsel %vm52_vm0, %v308_v15, 0.0  ;;  %v107_v14 = vmul.f32 %v1253_v16, %v1253_v16 }
  0x8e   :  { %v126_v22 = vsel %vm52_vm0, %v106_v17, 0.0  ;;  %v58_v23 = vpop.xlane.xlu2 %57 }
  0x8f   :  { %v273_v13 = vpop.xlane.xlu0 %272  ;;  %335 = vadd.xlane.f32.xlu2 %v334_v12  ;;  %v85_v28 = vmul.f32 %v1200_v38, %v58_v23  ;;  %v129_v34 = vsel %vm52_vm0, %v107_v14, 0.0 }
  0x90   :  { %v293_v27 = vmul.f32 %v273_v13, %v1200_v38  ;;  %317 = vadd.xlane.f32.xlu0 %v316_v21  ;;  %127 = vadd.xlane.f32.xlu1 %v126_v22  ;;  %v55_v29 = vpop.xlane.xlu1 %54 }
  0x91   :  { %v84_v31 = vmul.f32 %v1200_v38, %v55_v29  ;;  %v1269_v33 = vsub.f32 %v1159_v19, %v85_v28 }
  0x92   :  { %v1266_v32 = vsub.f32 %v1154_v18, %v293_v27 }
  0x93   :  { %v101_v35 = vmul.f32 %v1269_v33, %v1269_v33  ;;  %v1277_v37 = vsub.f32 %v1164_v20, %v84_v31 }
  0x94   :  { %v309_v36 = vmul.f32 %v1266_v32, %v1266_v32 }
  0x95   :  { %v111_v39 = vsel %vm52_vm0, %v101_v35, 0.0  ;;  %v100_v43 = vmul.f32 %v1277_v37, %v1277_v37 }
  0x96   :  { %v319_v40 = vsel %vm52_vm0, %v309_v36, 0.0  ;;  %v67_v41 = vpop.xlane.xlu2 %66 }
  0x97   :  { %v282_v18 = vpop.xlane.xlu0 %281  ;;  %130 = vadd.xlane.f32.xlu2 %v129_v34  ;;  %v88_v42 = vmul.f32 %v1200_v38, %v67_v41  ;;  %v108_v51 = vsel %vm52_vm0, %v100_v43, 0.0 }
  0x98   :  { %v296_v19 = vmul.f32 %v282_v18, %v1200_v38  ;;  %112 = vadd.xlane.f32.xlu0 %v111_v39  ;;  %320 = vadd.xlane.f32.xlu1 %v319_v40  ;;  %v285_v46 = vpop.xlane.xlu1 %284 }
  0x99   :  { %v297_v20 = vmul.f32 %v285_v46, %v1200_v38  ;;  %v1290_v48 = vsub.f32 %v1180_v25, %v88_v42 }
  0x9a   :  { %v1287_v47 = vsub.f32 %v1175_v24, %v296_v19 }
  0x9b   :  { %v104_v49 = vmul.f32 %v1290_v48, %v1290_v48  ;;  %v1298_v52 = vsub.f32 %v1185_v26, %v297_v20 }
  0x9c   :  { %v312_v50 = vmul.f32 %v1287_v47, %v1287_v47 }
  0x9d   :  { %v120_v53 = vsel %vm52_vm0, %v104_v49, 0.0  ;;  %v313_v55 = vmul.f32 %v1298_v52, %v1298_v52 }
  0x9e   :  { %v328_v54 = vsel %vm52_vm0, %v312_v50, 0.0 }
  0x9f   :  { %v70_v24 = vpop.xlane.xlu0 %69  ;;  %109 = vadd.xlane.f32.xlu2 %v108_v51  ;;  %v331_v60 = vsel %vm52_vm0, %v313_v55, 0.0 }
  0xa0   :  { %v89_v25 = vmul.f32 %v1200_v38, %v70_v24  ;;  %121 = vadd.xlane.f32.xlu0 %v120_v53  ;;  %329 = vadd.xlane.f32.xlu1 %v328_v54 }
  0xa2   :  { %v1306_v56 = vsub.f32 %v1196_v30, %v89_v25 }
  0xa4   :  { %v105_v26 = vmul.f32 %v1306_v56, %v1306_v56 }
  0xa6   :  { %v123_v61 = vsel %vm52_vm0, %v105_v26, 0.0 }
  0xa7   :  { %332 = vadd.xlane.f32.xlu2 %v331_v60 }
  0xa8   :  { %124 = vadd.xlane.f32.xlu1 %v123_v61 }
  0xf2   :  { %v324_v62 = vpop.xlane.xlu1 %323 }
  0xf3   :  { %v116_v1 = vpop.xlane.xlu0 %115  ;;  %v342_v2 = vmul.f32 %v324_v62, %v1200_v38 }
  0xf4   :  { %v134_v3 = vmul.f32 %v116_v1, %v1200_v38 }
  0xf5   :  { %v350_v4 = vadd.f32 1e-05, %v342_v2 }
  0xf6   :  { %v142_v5 = vadd.f32 1e-05, %v134_v3 }
  0xf7   :  { %989 = vrsqrt.f32 %v350_v4  ;;  %vm382_vm3 = vweird.f32 %v350_v4 }
  0xf8   :  { %991 = vrsqrt.f32 %v142_v5  ;;  %vm174_vm4 = vweird.f32 %v142_v5 }
  0xfa   :  { %v327_v30 = vpop.xlane.xlu2 %326 }
  0xfb   :  { %v339_v6 = vpop.xlane.xlu0 %338  ;;  %v343_v7 = vmul.f32 %v327_v30, %v1200_v38  ;;  %v119_v8 = vpop.xlane.xlu1 %118 }
  0xfc   :  { %v347_v9 = vmul.f32 %v339_v6, %v1200_v38  ;;  %v135_v11 = vmul.f32 %v119_v8, %v1200_v38 }
  0xfd   :  { %v1317_v15 = vpop.eup %989  ;;  %v1319_v17 = vadd.f32 1e-05, %v343_v7 }
  0xfe   :  { %v1321_v21 = vpop.eup %991  ;;  %v377_v12 = vmul.f32 %v1317_v15, %v350_v4  ;;  %v1324_v22 = vadd.f32 1e-05, %v347_v9  ;;  %v1326_v13 = vadd.f32 1e-05, %v135_v11  ;;  %vm383_vm2 = vweird.f32 %v1317_v15 }
  0xff   :  { %v169_v23 = vmul.f32 %v1321_v21, %v142_v5  ;;  %993 = vrsqrt.f32 %v1319_v17  ;;  %vm175_vm5 = vweird.f32 %v1321_v21  ;;  %vm1361_vm6 = vmor %vm382_vm3, %vm383_vm2  ;;  %vm392_vm10 = vweird.f32 %v1319_v17 }
 0x100   :  { %v378_v27 = vmul.f32 %v1317_v15, %v377_v12  ;;  %995 = vrsqrt.f32 %v1324_v22  ;;  %vm1372_vm7 = vmor %vm174_vm4, %vm175_vm5  ;;  %vm432_vm8 = vweird.f32 %v1324_v22  ;;  %vm184_vm9 = vweird.f32 %v1326_v13 }
 0x101   :  { %v170_v28 = vmul.f32 %v1321_v21, %v169_v23  ;;  %997 = vrsqrt.f32 %v1326_v13 }
 0x102   :  { %v379_v14 = vmul.f32 0.5, %v378_v27  ;;  %v336_v29 = vpop.xlane.xlu2 %335 }
 0x103   :  { %v171_v31 = vmul.f32 0.5, %v170_v28  ;;  %v318_v34 = vpop.xlane.xlu0 %317  ;;  %v346_v35 = vmul.f32 %v336_v29, %v1200_v38  ;;  %v128_v36 = vpop.xlane.xlu1 %127 }
 0x104   :  { %v380_v39 = vsub.f32 1.5, %v379_v14  ;;  %v340_v40 = vmul.f32 %v318_v34, %v1200_v38  ;;  %v138_v20 = vmul.f32 %v128_v36, %v1200_v38 }
 0x105   :  { %v1336_v18 = vpop.eup %993  ;;  %v172_v41 = vsub.f32 1.5, %v171_v31  ;;  %v1338_v19 = vadd.f32 1e-05, %v346_v35  ;;  %v1410_v35 = vld [vmem:[%s1820_s6] ss:$0 sm:$0xff] }
 0x106   :  { %v1340_v42 = vpop.eup %995  ;;  %v387_v43 = vmul.f32 %v1336_v18, %v1319_v17  ;;  %v1344_v46 = vadd.f32 1e-05, %v340_v40  ;;  %v381_v50 = vmul.f32 %v1317_v15, %v380_v39  ;;  %v1366_v60 = vadd.f32 1e-05, %v138_v20 }
 0x107   :  { %v1347_v49 = vpop.eup %997  ;;  %v427_v51 = vmul.f32 %v1340_v42, %v1324_v22  ;;  %999 = vrsqrt.f32 %v1338_v19  ;;  %v173_v24 = vmul.f32 %v1321_v21, %v172_v41  ;;  %vm393_vm11 = vweird.f32 %v1336_v18 }
 0x108   :  { %v388_v53 = vmul.f32 %v1336_v18, %v387_v43  ;;  %v179_v54 = vmul.f32 %v1347_v49, %v1326_v13  ;;  %1001 = vrsqrt.f32 %v1344_v46  ;;  %v385_v4 = vsel %vm1361_vm6, %v1317_v15, %v381_v50 }
 0x109   :  { %v428_v25 = vmul.f32 %v1340_v42, %v427_v51  ;;  %1003 = vrsqrt.f32 %v1366_v60  ;;  %v177_v8 = vsel %vm1372_vm7, %v1321_v21, %v173_v24  ;;  %v438_v28 = vmul.f32 %v385_v4, %v1204_v44  ;;  %v1396_v21 = vld [vmem:[%s1819_s5] ss:$0 sm:$0xff] }
 0x10a   :  { %v180_v26 = vmul.f32 %v1347_v49, %v179_v54  ;;  %v131_v61 = vpop.xlane.xlu2 %130  ;;  %v389_v30 = vmul.f32 0.5, %v388_v53  ;;  %vm433_vm12 = vweird.f32 %v1340_v42  ;;  %vm185_vm13 = vweird.f32 %v1347_v49  ;;  %v1428_v53 = vld [vmem:[%s1821_s3] ss:$0 sm:$0xff] }
 0x10b   :  { %v429_v62 = vmul.f32 0.5, %v428_v25  ;;  %v113_v1 = vpop.xlane.xlu0 %112  ;;  %v139_v2 = vmul.f32 %v131_v61, %v1200_v38  ;;  %v321_v3 = vpop.xlane.xlu1 %320  ;;  %v230_v39 = vmul.f32 %v177_v8, %v1206_v45  ;;  %vm214_vm14 = vweird.f32 %v1366_v60  ;;  %vm1434_vm15 = vmor %vm432_vm8, %vm433_vm12 }
 0x10c   :  { %v181_v6 = vmul.f32 0.5, %v180_v26  ;;  %v133_v9 = vmul.f32 %v113_v1, %v1200_v38  ;;  %v341_v27 = vmul.f32 %v321_v3, %v1200_v38  ;;  %v390_v34 = vsub.f32 1.5, %v389_v30  ;;  %vm1464_vm4 = vmor %vm184_vm9, %vm185_vm13 }
 0x10d   :  { %v1378_v7 = vpop.eup %999  ;;  %v1385_v11 = vadd.f32 1e-05, %v139_v2  ;;  %v430_v12 = vsub.f32 1.5, %v429_v62  ;;  %v449_v50 = vmul.f32 %v1396_v21, %v438_v28  ;;  %vm422_vm1 = vweird.f32 %v1338_v19  ;;  %vm1490_vm8 = vmor %vm392_vm10, %vm393_vm11 }
 0x10e   :  { %v1387_v15 = vpop.eup %1001  ;;  %v417_v23 = vmul.f32 %v1378_v7, %v1338_v19  ;;  %v182_v14 = vsub.f32 1.5, %v181_v6  ;;  %v1402_v31 = vadd.f32 1e-05, %v133_v9  ;;  %v1422_v20 = vadd.f32 1e-05, %v341_v27 }
 0x10f   :  { %v357_v29 = vmul.f32 %v1387_v15, %v1344_v46  ;;  %1005 = vrsqrt.f32 %v1385_v11  ;;  %v1416_v40 = vpop.eup %1003  ;;  %v1419_v41 = vmul.f32 %v1340_v42, %v430_v12  ;;  %v391_v61 = vmul.f32 %v1336_v18, %v390_v34  ;;  %v1474_v12 = vld [vmem:[%s1822_s4] ss:$0 sm:$0xff] }
 0x110   :  { %v418_v44 = vmul.f32 %v1378_v7, %v417_v23  ;;  %1007 = vrsqrt.f32 %v1402_v31  ;;  %v1439_v54 = vmul.f32 %v1347_v49, %v182_v14  ;;  %v209_v25 = vmul.f32 %v1416_v40, %v1366_v60 }
 0x111   :  { %v358_v36 = vmul.f32 %v1387_v15, %v357_v29  ;;  %1009 = vrsqrt.f32 %v1422_v20  ;;  %v460_v22 = vadd.f32 %v1410_v35, %v449_v50  ;;  %vm362_vm2 = vweird.f32 %v1344_v46 }
 0x112   :  { %v419_v43 = vmul.f32 0.5, %v418_v44  ;;  %v110_v51 = vpop.xlane.xlu2 %109  ;;  %vm423_vm3 = vweird.f32 %v1378_v7  ;;  %v210_v1 = vmul.f32 %v1416_v40, %v209_v25  ;;  %v435_v30 = vsel %vm1434_vm15, %v1340_v42, %v1419_v41 }
 0x113   :  { %v359_v24 = vmul.f32 0.5, %v358_v36  ;;  %v122_v55 = vpop.xlane.xlu0 %121  ;;  %v132_v26 = vmul.f32 %v110_v51, %v1200_v38  ;;  %v330_v4 = vpop.xlane.xlu1 %329  ;;  %vm363_vm5 = vweird.f32 %v1387_v15  ;;  %962 = vmatpush.xpose.msk.msra.mxu2 %vm52_vm0, %v460_v22  ;;  %v241_v9 = vmul.f32 %v1428_v53, %v230_v39  ;;  %vm1524_vm11 = vmor %vm422_vm1, %vm423_vm3 }
 0x114   :  { %v420_v62 = vsub.f32 1.5, %v419_v43  ;;  %v136_v2 = vmul.f32 %v122_v55, %v1200_v38  ;;  %v187_v13 = vsel %vm1464_vm4, %v1347_v49, %v1439_v54  ;;  %v211_v23 = vmul.f32 0.5, %v210_v1 }
 0x115   :  { %v1452_v3 = vadd.f32 1e-05, %v132_v26  ;;  %v1454_v5 = vpop.eup %1005  ;;  %v360_v8 = vsub.f32 1.5, %v359_v24  ;;  %vm215_vm6 = vweird.f32 %v1416_v40  ;;  %vm164_vm7 = vweird.f32 %v1402_v31 }
 0x116   :  { %v1476_v42 = vpop.eup %1007  ;;  %v219_v27 = vmul.f32 %v1454_v5, %v1385_v11  ;;  %v1495_v14 = vmul.f32 %v1378_v7, %v420_v62  ;;  %vm224_vm9 = vweird.f32 %v1385_v11  ;;  %v1500_v34 = vadd.f32 1e-05, %v136_v2  ;;  %vm1539_vm12 = vmor %vm214_vm14, %vm215_vm6 }
 0x117   :  { %v159_v29 = vmul.f32 %v1476_v42, %v1402_v31  ;;  %v344_v44 = vmul.f32 %v330_v4, %v1200_v38  ;;  %v212_v36 = vsub.f32 1.5, %v211_v23  ;;  %1011 = vrsqrt.f32 %v1452_v3  ;;  %v1508_v41 = vpop.eup %1009  ;;  %vm1563_vm14 = vmor %vm362_vm2, %vm363_vm5 }
 0x118   :  { %v220_v39 = vmul.f32 %v1454_v5, %v219_v27  ;;  %v395_v17 = vsel %vm1490_vm8, %v1336_v18, %v391_v61  ;;  %v1511_v43 = vmul.f32 %v1387_v15, %v360_v8  ;;  %1013 = vrsqrt.f32 %v1500_v34 }
 0x119   :  { %v160_v50 = vmul.f32 %v1476_v42, %v159_v29  ;;  %v252_v51 = vadd.f32 %v1474_v12, %v241_v9  ;;  %v213_v45 = vmul.f32 %v1416_v40, %v212_v36  ;;  %vm225_vm10 = vweird.f32 %v1454_v5 }
 0x11a   :  { %v221_v24 = vmul.f32 0.5, %v220_v39  ;;  %v367_v25 = vmul.f32 %v1508_v41, %v1422_v20  ;;  %v1528_v61 = vadd.f32 1e-05, %v344_v44  ;;  %v439_v62 = vmul.f32 %v395_v17, %v1222_v58  ;;  %v333_v4 = vpop.xlane.xlu2 %332  ;;  %vm1580_vm2 = vmor %vm224_vm9, %vm225_vm10 }
 0x11b   :  { %v161_v55 = vmul.f32 0.5, %v160_v50  ;;  %v260_v26 = vmul.f32 0.35355338, %v252_v51  ;;  %v425_v22 = vsel %vm1524_vm11, %v1378_v7, %v1495_v14  ;;  %vm372_vm13 = vweird.f32 %v1422_v20  ;;  %v125_v39 = vpop.xlane.xlu1 %124 }
 0x11c   :  { %v222_v1 = vsub.f32 1.5, %v221_v24  ;;  %v368_v2 = vmul.f32 %v1508_v41, %v367_v25  ;;  %v443_v58 = vmul.f32 %v435_v30, %v1219_v57  ;;  %v217_v7 = vsel %vm1539_vm12, %v1416_v40, %v213_v45 }
 0x11d   :  { %v162_v8 = vsub.f32 1.5, %v161_v55  ;;  %vm165_vm15 = vweird.f32 %v1476_v42  ;;  %963 = vmatmul.msk.f32.vlgmr.msra.gmra.mxu2 %vm52_vm0, %v260_v26  ;;  %1015 = vrsqrt.f32 %v1528_v61  ;;  %v1552_v60 = vpop.eup %1011  ;;  %v450_v27 = vmul.f32 %v1396_v21, %v439_v62 }
 0x11e   :  { %v223_v9 = vmul.f32 %v1454_v5, %v222_v1  ;;  %v369_v23 = vmul.f32 0.5, %v368_v2  ;;  %v454_v57 = vmul.f32 %v1396_v21, %v443_v58  ;;  %v1557_v30 = vpop.eup %1013  ;;  %vm373_vm1 = vweird.f32 %v1508_v41  ;;  %vm1592_vm8 = vmor %vm164_vm7, %vm165_vm15 }
 0x11f   :  { %vm194_vm3 = vweird.f32 %v1500_v34  ;;  %v149_v28 = vmul.f32 %v1552_v60, %v1452_v3  ;;  %v345_v14 = vmul.f32 %v333_v4, %v1200_v38  ;;  %v234_v29 = vmul.f32 %v217_v7, %v1246_v10  ;;  %vm1641_vm4 = vmor %vm372_vm13, %vm373_vm1 }
 0x120   :  { %v1574_v44 = vmul.f32 %v1476_v42, %v162_v8  ;;  %v189_v36 = vmul.f32 %v1557_v30, %v1500_v34  ;;  %vm154_vm5 = vweird.f32 %v1452_v3  ;;  %vm155_vm6 = vweird.f32 %v1552_v60 }
 0x121   :  { %v227_v11 = vsel %vm1580_vm2, %v1454_v5, %v223_v9  ;;  %v370_v17 = vsub.f32 1.5, %v369_v23  ;;  %v150_v50 = vmul.f32 %v1552_v60, %v149_v28  ;;  %v461_v51 = vadd.f32 %v1410_v35, %v450_v27  ;;  %vm1663_vm11 = vmor %vm154_vm5, %vm155_vm6 }
 0x122   :  { %v190_v45 = vmul.f32 %v1557_v30, %v189_v36  ;;  %vm195_vm9 = vweird.f32 %v1557_v30  ;;  %vm402_vm10 = vweird.f32 %v1528_v61  ;;  %v465_v31 = vadd.f32 %v1410_v35, %v454_v57 }
 0x123   :  { %v1605_v24 = vadd.f32 1e-05, %v345_v14  ;;  %v1607_v25 = vpop.eup %1015  ;;  %v151_v18 = vmul.f32 0.5, %v150_v50  ;;  %964 = vmatpush.xpose.msk.msra.mxu3 %vm52_vm0, %v461_v51  ;;  %v231_v5 = vmul.f32 %v187_v13, %v1225_v59  ;;  %v137_v55 = vmul.f32 %v125_v39, %v1200_v38  ;;  %vm1653_vm7 = vmor %vm194_vm3, %vm195_vm9 }
 0x124   :  { %v365_v26 = vsel %vm1563_vm14, %v1387_v15, %v1511_v43  ;;  %v167_v62 = vsel %vm1592_vm8, %v1476_v42, %v1574_v44  ;;  %v191_v19 = vmul.f32 0.5, %v190_v45  ;;  %v397_v6 = vmul.f32 %v1607_v25, %v1528_v61 }
 0x125   :  { %1017 = vrsqrt.f32 %v1605_v24  ;;  %v371_v38 = vmul.f32 %v1508_v41, %v370_v17  ;;  %v152_v59 = vsub.f32 1.5, %v151_v18  ;;  %v242_v49 = vmul.f32 %v1428_v53, %v231_v5 }
 0x126   :  { %v1631_v54 = vadd.f32 1e-05, %v137_v55  ;;  %v192_v15 = vsub.f32 1.5, %v191_v19  ;;  %v398_v13 = vmul.f32 %v1607_v25, %v397_v6  ;;  %v436_v42 = vmul.f32 %v365_v26, %v1243_v0 }
 0x127   :  { %972 = vmatpush.xpose.msk.msrb.mxu3 %vm52_vm0, %v465_v31  ;;  %v442_v43 = vmul.f32 %v425_v22, %v1234_v63  ;;  %v235_v1 = vmul.f32 %v227_v11, %v1253_v16  ;;  %v153_v58 = vmul.f32 %v1552_v60, %v152_v59  ;;  %v253_v4 = vadd.f32 %v1474_v12, %v242_v49 }
 0x128   :  { %1019 = vrsqrt.f32 %v1631_v54  ;;  %v193_v0 = vmul.f32 %v1557_v30, %v192_v15  ;;  %v399_v16 = vmul.f32 0.5, %v398_v13  ;;  %v447_v20 = vmul.f32 %v1396_v21, %v436_v42 }
 0x129   :  { %v453_v22 = vmul.f32 %v1396_v21, %v442_v43  ;;  %vm403_vm12 = vweird.f32 %v1607_v25  ;;  %v261_v34 = vmul.f32 0.35355338, %v253_v4  ;;  %v245_v8 = vmul.f32 %v1428_v53, %v234_v29 }
 0x12a   :  { %v375_v9 = vsel %vm1641_vm4, %v1508_v41, %v371_v38  ;;  %v157_v27 = vsel %vm1663_vm11, %v1552_v60, %v153_v58  ;;  %v400_v57 = vsub.f32 1.5, %v399_v16  ;;  %v458_v3 = vadd.f32 %v1410_v35, %v447_v20  ;;  %vm404_vm13 = vmor %vm402_vm10, %vm403_vm12 }
 0x12b   :  { %v1018_v23 = vpop.eup %1017  ;;  %v464_v40 = vadd.f32 %v1410_v35, %v453_v22  ;;  %v197_v28 = vsel %vm1653_vm7, %v1557_v30, %v193_v0  ;;  %965 = vmatmul.msk.f32.vlgmr.msra.gmra.mxu3 %vm52_vm0, %v261_v34  ;;  %v256_v41 = vadd.f32 %v1474_v12, %v245_v8  ;;  %v437_v60 = vmul.f32 %v375_v9, %v1266_v32 }
 0x12c   :  { %v407_v14 = vmul.f32 %v1018_v23, %v1605_v24  ;;  %v401_v29 = vmul.f32 %v1607_v25, %v400_v57  ;;  %958 = vmatpush.xpose.msk.msra.mxu0 %vm52_vm0, %v458_v3  ;;  %v246_v44 = vmul.f32 %v1428_v53, %v235_v1  ;;  %v229_v39 = vmul.f32 %v167_v62, %v1269_v33 }
 0x12d   :  { %970 = vmatpush.xpose.msk.msrb.mxu2 %vm52_vm0, %v464_v40  ;;  %v264_v36 = vmul.f32 0.35355338, %v256_v41  ;;  %v228_v10 = vmul.f32 %v157_v27, %v1277_v37  ;;  %v232_v11 = vmul.f32 %v197_v28, %v1290_v48  ;;  %v448_v50 = vmul.f32 %v1396_v21, %v437_v60 }
 0x12e   :  { %v1020_v46 = vpop.eup %1019  ;;  %v408_v30 = vmul.f32 %v1018_v23, %v407_v14  ;;  %v405_v17 = vsel %vm404_vm13, %v1607_v25, %v401_v29  ;;  %v257_v61 = vadd.f32 %v1474_v12, %v246_v44  ;;  %v240_v45 = vmul.f32 %v1428_v53, %v229_v39 }
 0x12f   :  { %v199_v32 = vmul.f32 %v1020_v46, %v1631_v54  ;;  %v440_v31 = vmul.f32 %v405_v17, %v1287_v47  ;;  %vm413_vm15 = vweird.f32 %v1018_v23  ;;  %v459_v37 = vadd.f32 %v1410_v35, %v448_v50 }
 0x130   :  { %v409_v51 = vmul.f32 0.5, %v408_v30  ;;  %971 = vmatmul.msk.f32.vlgmr.msrb.gmra.mxu2 %vm52_vm0, %v264_v36  ;;  %v239_v48 = vmul.f32 %v1428_v53, %v228_v10  ;;  %v265_v18 = vmul.f32 0.35355338, %v257_v61  ;;  %v251_v5 = vadd.f32 %v1474_v12, %v240_v45 }
 0x131   :  { %v200_v33 = vmul.f32 %v1020_v46, %v199_v32  ;;  %v451_v55 = vmul.f32 %v1396_v21, %v440_v31  ;;  %vm412_vm14 = vweird.f32 %v1605_v24  ;;  %960 = vmatpush.xpose.msk.msra.mxu1 %vm52_vm0, %v459_v37  ;;  %vm204_vm1 = vweird.f32 %v1631_v54 }
 0x132   :  { %v410_v25 = vsub.f32 1.5, %v409_v51  ;;  %v250_v62 = vadd.f32 %v1474_v12, %v239_v48  ;;  %v259_v19 = vmul.f32 0.35355338, %v251_v5  ;;  %vm414_vm3 = vmor %vm412_vm14, %vm413_vm15  ;;  %vm205_vm2 = vweird.f32 %v1020_v46 }
 0x133   :  { %v201_v26 = vmul.f32 0.5, %v200_v33  ;;  %973 = vmatmul.msk.f32.vlgmr.msrb.gmra.mxu3 %vm52_vm0, %v265_v18  ;;  %v462_v6 = vadd.f32 %v1410_v35, %v451_v55  ;;  %v243_v24 = vmul.f32 %v1428_v53, %v232_v11  ;;  %vm206_vm5 = vmor %vm204_vm1, %vm205_vm2 }
 0x134   :  { %v411_v47 = vmul.f32 %v1018_v23, %v410_v25  ;;  %v258_v59 = vmul.f32 0.35355338, %v250_v62  ;;  %961 = vmatmul.msk.f32.vlgmr.msra.gmra.mxu1 %vm52_vm0, %v259_v19 }
 0x135   :  { %v202_v38 = vsub.f32 1.5, %v201_v26  ;;  %966 = vmatpush.xpose.msk.msrb.mxu0 %vm52_vm0, %v462_v6  ;;  %v254_v1 = vadd.f32 %v1474_v12, %v243_v24 }
 0x136   :  { %v415_v49 = vsel %vm414_vm3, %v1018_v23, %v411_v47  ;;  %959 = vmatmul.msk.f32.vlgmr.msra.gmra.mxu0 %vm52_vm0, %v258_v59 }
 0x137   :  { %v203_v15 = vmul.f32 %v1020_v46, %v202_v38  ;;  %v441_v13 = vmul.f32 %v415_v49, %v1298_v52  ;;  %v262_v0 = vmul.f32 0.35355338, %v254_v1  ;;  %v45_v1 = vld [vmem:[%s1823_s2 + $0x18] sm:$0xff] }
 0x138   :  { %849 = vmatpush.msra.mxu3 %v45_v1 }
 0x139   :  { %v207_v42 = vsel %vm206_vm5, %v1020_v46, %v203_v15  ;;  %v452_v43 = vmul.f32 %v1396_v21, %v441_v13 }
 0x13a   :  { %v233_v2 = vmul.f32 %v207_v42, %v1306_v56 }
 0x13b   :  { %v463_v58 = vadd.f32 %v1410_v35, %v452_v43  ;;  %v44_v43 = vld [vmem:[%s1823_s2 + $0x10] sm:$0xff] }
 0x13c   :  { %v244_v4 = vmul.f32 %v1428_v53, %v233_v2  ;;  %826 = vmatpush.msra.mxu2 %v44_v43  ;;  %v48_v2 = vld [vmem:[%s1823_s2 + $0x30] sm:$0xff] }
 0x13d   :  { %968 = vmatpush.xpose.msk.msrb.mxu1 %vm52_vm0, %v463_v58 }
 0x13e   :  { %v255_v63 = vadd.f32 %v1474_v12, %v244_v4  ;;  %967 = vmatmul.msk.f32.vlgmr.msrb.gmra.mxu0 %vm52_vm0, %v262_v0  ;;  %918 = vmatpush.msrb.mxu2 %v48_v2  ;;  %v43_v4 = vld [vmem:[%s1823_s2 + $0x8] sm:$0xff]  ;;  %v42_v0 = vld [vmem:[%s1823_s2] sm:$0xff] }
 0x13f   :  { %780 = vmatpush.msra.mxu0 %v42_v0 }
 0x140   :  { %v263_v52 = vmul.f32 0.35355338, %v255_v63  ;;  %v49_v63 = vld [vmem:[%s1823_s2 + $0x38] sm:$0xff] }
 0x141   :  { %803 = vmatpush.msra.mxu1 %v43_v4  ;;  %941 = vmatpush.msrb.mxu3 %v49_v63 }
 0x142   :  { %969 = vmatmul.msk.f32.vlgmr.msrb.gmra.mxu1 %vm52_vm0, %v263_v52  ;;  %v46_v52 = vld [vmem:[%s1823_s2 + $0x20] sm:$0xff] }
 0x143   :  { %872 = vmatpush.msrb.mxu0 %v46_v52 }
 0x1a0   :  { %v541_v54 = vpop.f32.mrf.mxu2 }
 0x1a1   :  { %v680_v21 = vsel %vm52_vm0, %v541_v54, -inf }
 0x1a2   :  { %681 = vmax.xlane.f32.xlu2 %v680_v21 }
 0x1ae   :  { %v567_v16 = vpop.f32.mrf.mxu3 }
 0x1af   :  { %v683_v56 = vsel %vm52_vm0, %v567_v16, -inf }
 0x1b0   :  { %684 = vmax.xlane.f32.xlu0 %v683_v56 }
 0x1b1   :  { %v515_v53 = vpop.f32.mrf.mxu1 }
 0x1b2   :  { %v677_v20 = vsel %vm52_vm0, %v515_v53, -inf }
 0x1b3   :  { %v645_v35 = vpop.f32.mrf.mxu2  ;;  %v489_v22 = vpop.f32.mrf.mxu0  ;;  %678 = vmax.xlane.f32.xlu2 %v677_v20 }
 0x1b4   :  { %v674_v12 = vsel %vm52_vm0, %v489_v22, -inf  ;;  %v692_v7 = vsel %vm52_vm0, %v645_v35, -inf }
 0x1b5   :  { %675 = vmax.xlane.f32.xlu1 %v674_v12 }
 0x1b6   :  { %v671_v34 = vpop.f32.mrf.mxu3 }
 0x1b7   :  { %v695_v9 = vsel %vm52_vm0, %v671_v34, -inf }
 0x1b8   :  { %693 = vmax.xlane.f32.xlu0 %v692_v7 }
 0x1bb   :  { %v593_v8 = vpop.f32.mrf.mxu0 }
 0x1bc   :  { %v686_v23 = vsel %vm52_vm0, %v593_v8, -inf }
 0x1bd   :  { %696 = vmax.xlane.f32.xlu1 %v695_v9  ;;  %687 = vmax.xlane.f32.xlu2 %v686_v23 }
 0x1bf   :  { %v619_v27 = vpop.f32.mrf.mxu1 }
 0x1c0   :  { %v689_v57 = vsel %vm52_vm0, %v619_v27, -inf }
 0x1c1   :  { %690 = vmax.xlane.f32.xlu0 %v689_v57 }
 0x215   :  { %v682_v3 = vpop.xlane.xlu2 %681 }
 0x216   :  { %v700_v40 = vsub.f32 %v541_v54, %v682_v3  ;;  %v47_v54 = vld [vmem:[%s1823_s2 + $0x28] sm:$0xff] }
 0x217   :  { %895 = vmatpush.msrb.mxu1 %v47_v54 }
 0x218   :  { %v710_v28 = vmul.f32 1.442695, %v700_v40 }
 0x21a   :  { %1021 = vpow2.f32 %v710_v28 }
 0x220   :  { %v1737_v14 = vpop.eup %1021 }
 0x221   :  { %v728_v41 = vsel %vm52_vm0, %v1737_v14, 0.0 }
 0x222   :  { %729 = vadd.xlane.f32.xlu1 %v728_v41 }
 0x223   :  { %v685_v29 = vpop.xlane.xlu0 %684 }
 0x224   :  { %v701_v60 = vsub.f32 %v567_v16, %v685_v29 }
 0x226   :  { %v712_v44 = vmul.f32 1.442695, %v701_v60  ;;  %v679_v46 = vpop.xlane.xlu2 %678 }
 0x227   :  { %v699_v30 = vsub.f32 %v515_v53, %v679_v46 }
 0x228   :  { %1023 = vpow2.f32 %v712_v44  ;;  %v676_v36 = vpop.xlane.xlu1 %675 }
 0x229   :  { %v698_v39 = vsub.f32 %v489_v22, %v676_v36  ;;  %v708_v10 = vmul.f32 1.442695, %v699_v30 }
 0x22b   :  { %v694_v11 = vpop.xlane.xlu0 %693  ;;  %v706_v17 = vmul.f32 1.442695, %v698_v39  ;;  %1025 = vpow2.f32 %v708_v10 }
 0x22c   :  { %v704_v32 = vsub.f32 %v645_v35, %v694_v11 }
 0x22d   :  { %1027 = vpow2.f32 %v706_v17 }
 0x22e   :  { %v1741_v50 = vpop.eup %1023  ;;  %v718_v51 = vmul.f32 1.442695, %v704_v32 }
 0x22f   :  { %v731_v61 = vsel %vm52_vm0, %v1741_v50, 0.0 }
 0x230   :  { %1029 = vpow2.f32 %v718_v51  ;;  %732 = vadd.xlane.f32.xlu2 %v731_v61  ;;  %v688_v45 = vpop.xlane.xlu2 %687  ;;  %v697_v31 = vpop.xlane.xlu1 %696 }
 0x231   :  { %v702_v33 = vsub.f32 %v593_v8, %v688_v45  ;;  %v705_v37 = vsub.f32 %v671_v34, %v697_v31  ;;  %v1026_v48 = vpop.eup %1025 }
 0x232   :  { %v725_v18 = vsel %vm52_vm0, %v1026_v48, 0.0 }
 0x233   :  { %v1028_v25 = vpop.eup %1027  ;;  %v714_v5 = vmul.f32 1.442695, %v702_v33  ;;  %v720_v55 = vmul.f32 1.442695, %v705_v37  ;;  %726 = vadd.xlane.f32.xlu1 %v725_v18 }
 0x234   :  { %v691_v26 = vpop.xlane.xlu0 %690  ;;  %v722_v47 = vsel %vm52_vm0, %v1028_v25, 0.0 }
 0x235   :  { %v703_v62 = vsub.f32 %v619_v27, %v691_v26  ;;  %1031 = vpow2.f32 %v714_v5  ;;  %723 = vadd.xlane.f32.xlu0 %v722_v47 }
 0x236   :  { %v1030_v19 = vpop.eup %1029  ;;  %1033 = vpow2.f32 %v720_v55 }
 0x237   :  { %v716_v6 = vmul.f32 1.442695, %v703_v62  ;;  %v740_v38 = vsel %vm52_vm0, %v1030_v19, 0.0 }
 0x238   :  { %741 = vadd.xlane.f32.xlu2 %v740_v38 }
 0x239   :  { %1035 = vpow2.f32 %v716_v6 }
 0x23b   :  { %v1032_v59 = vpop.eup %1031 }
 0x23c   :  { %v1034_v24 = vpop.eup %1033  ;;  %v734_v49 = vsel %vm52_vm0, %v1032_v59, 0.0 }
 0x23d   :  { %735 = vadd.xlane.f32.xlu1 %v734_v49  ;;  %v743_v15 = vsel %vm52_vm0, %v1034_v24, 0.0 }
 0x23e   :  { %744 = vadd.xlane.f32.xlu0 %v743_v15 }
 0x23f   :  { %v1036_v13 = vpop.eup %1035 }
 0x240   :  { %v737_v42 = vsel %vm52_vm0, %v1036_v13, 0.0 }
 0x241   :  { %738 = vadd.xlane.f32.xlu2 %v737_v42 }
 0x295   :  { %v730_v58 = vpop.xlane.xlu1 %729 }
 0x296   :  { %1037 = vrcp.f32 %v730_v58 }
 0x29c   :  { %v1038_v21 = vpop.eup %1037 }
 0x29d   :  { %v756_v16 = vmul.f32 %v1038_v21, %v1737_v14 }
 0x29f   :  { %976 = vmatmul.msk.f32.vlgmr.msra.gmra.mxu2 %vm52_vm0, %v756_v16 }
 0x2a3   :  { %v733_v56 = vpop.xlane.xlu2 %732 }
 0x2a4   :  { %1039 = vrcp.f32 %v733_v56 }
 0x2a6   :  { %v727_v35 = vpop.xlane.xlu1 %726 }
 0x2a7   :  { %1041 = vrcp.f32 %v727_v35 }
 0x2a8   :  { %v724_v53 = vpop.xlane.xlu0 %723 }
 0x2a9   :  { %1043 = vrcp.f32 %v724_v53 }
 0x2aa   :  { %v1040_v20 = vpop.eup %1039 }
 0x2ab   :  { %v757_v22 = vmul.f32 %v1040_v20, %v1741_v50  ;;  %v742_v12 = vpop.xlane.xlu2 %741 }
 0x2ac   :  { %1045 = vrcp.f32 %v742_v12 }
 0x2ad   :  { %977 = vmatmul.msk.f32.vlgmr.msra.gmra.mxu3 %vm52_vm0, %v757_v22  ;;  %v1042_v7 = vpop.eup %1041 }
 0x2ae   :  { %v755_v8 = vmul.f32 %v1042_v7, %v1026_v48 }
 0x2af   :  { %v1044_v34 = vpop.eup %1043 }
 0x2b0   :  { %v754_v9 = vmul.f32 %v1044_v34, %v1028_v25  ;;  %v736_v23 = vpop.xlane.xlu1 %735  ;;  %975 = vmatmul.msk.f32.vlgmr.msra.gmra.mxu1 %vm52_vm0, %v755_v8 }
 0x2b1   :  { %v745_v27 = vpop.xlane.xlu0 %744  ;;  %1047 = vrcp.f32 %v736_v23 }
 0x2b2   :  { %v1046_v57 = vpop.eup %1045  ;;  %1049 = vrcp.f32 %v745_v27  ;;  %974 = vmatmul.msk.f32.vlgmr.msra.gmra.mxu0 %vm52_vm0, %v754_v9 }
 0x2b3   :  { %v760_v3 = vmul.f32 %v1046_v57, %v1030_v19 }
 0x2b4   :  { %v739_v40 = vpop.xlane.xlu2 %738 }
 0x2b5   :  { %1051 = vrcp.f32 %v739_v40  ;;  %980 = vmatmul.msk.f32.vlgmr.msrb.gmra.mxu2 %vm52_vm0, %v760_v3 }
 0x2b7   :  { %v1048_v28 = vpop.eup %1047 }
 0x2b8   :  { %v1050_v14 = vpop.eup %1049  ;;  %v758_v41 = vmul.f32 %v1048_v28, %v1032_v59 }
 0x2b9   :  { %v761_v29 = vmul.f32 %v1050_v14, %v1034_v24 }
 0x2ba   :  { %978 = vmatmul.msk.f32.vlgmr.msrb.gmra.mxu0 %vm52_vm0, %v758_v41 }
 0x2bb   :  { %v1052_v60 = vpop.eup %1051  ;;  %981 = vmatmul.msk.f32.vlgmr.msrb.gmra.mxu3 %vm52_vm0, %v761_v29 }
 0x2bc   :  { %v759_v44 = vmul.f32 %v1052_v60, %v1036_v13 }
 0x2be   :  { %979 = vmatmul.msk.f32.vlgmr.msrb.gmra.mxu1 %vm52_vm0, %v759_v44 }
 0x322   :  { %v828_v46 = vpop.f32.mrf.mxu2 }
 0x323   :  { %948 = vst.msk [vmem:[%s1824_s7 + $0x10] sm:$0xff] %vm52_vm0, %v828_v46 }
 0x32d   :  { %v805_v30 = vpop.f32.mrf.mxu1 }
 0x32e   :  { %947 = vst.msk [vmem:[%s1824_s7 + $0x8] sm:$0xff] %vm52_vm0, %v805_v30 }
 0x32f   :  { %v782_v36 = vpop.f32.mrf.mxu0 }
 0x330   :  { %v851_v39 = vpop.f32.mrf.mxu3  ;;  %946 = vst.msk [vmem:[%s1824_s7] sm:$0xff] %vm52_vm0, %v782_v36 }
 0x331   :  { %949 = vst.msk [vmem:[%s1824_s7 + $0x18] sm:$0xff] %vm52_vm0, %v851_v39 }
 0x337   :  { %v874_v10 = vpop.f32.mrf.mxu0 }
 0x338   :  { %v920_v11 = vpop.f32.mrf.mxu2  ;;  %950 = vst.msk [vmem:[%s1824_s7 + $0x20] sm:$0xff] %vm52_vm0, %v874_v10 }
 0x339   :  { %952 = vst.msk [vmem:[%s1824_s7 + $0x30] sm:$0xff] %vm52_vm0, %v920_v11 }
 0x33b   :  { %v897_v17 = vpop.f32.mrf.mxu1 }
 0x33c   :  { %951 = vst.msk [vmem:[%s1824_s7 + $0x28] sm:$0xff] %vm52_vm0, %v897_v17 }
 0x33e   :  { %v943_v32 = vpop.f32.mrf.mxu3 }
 0x33f   :  { %953 = vst.msk [vmem:[%s1824_s7 + $0x38] sm:$0xff] %vm52_vm0, %v943_v32 }

// kernel: q_block_forward.12
= control target key start
LH: loop header
LB: loop body
LE: loop exit
PB: predicated region body
PF: predicated region fallthrough
CT: control target
= control target key end

     0   :  { %9 = vsyncpa [#allocation4], 0  ;;  %s152_s18 = smov [#allocation3]   ;;  %s202_s0 = inlined_call_operand.vmem [shape: f32[2], index: 0, kind: input, shape index: {}]   ;;  %s203_s1 = inlined_call_operand.vmem [shape: f32[16,32], index: 1, kind: input, shape index: {}]   ;;  %s204_s2 = inlined_call_operand.vmem [shape: bf16[32,128], index: 2, kind: input, shape index: {}]   ;;  %s205_s3 = inlined_call_operand.vmem [shape: f32[1,128], index: 3, kind: input, shape index: {}]   ;;  %s206_s4 = inlined_call_operand.vmem [shape: f32[16,128], index: 4, kind: output, shape index: {}]  }
   0x1   :  { %s15_s17 = sshll.u32 %s202_s0, 4  ;;  %s16_s17 = int_to_ptr.vmem [resolvable:$true] %s15_s17 }
   0x2   :  { %18 = dma.vmem_to_smem %s16_s17, 16, %s152_s18, [#allocation4]  }
   0x3   :  { %150 = dma.done.wait [#allocation4], 16  }
   0x4   :  { %151 = vsyncadd [#allocation4], 4294967280 }
   0x5   :  { %29 = sfence }
   0x6   :  { %v119_v0 = vld [vmem:[%s204_s2 + $0x8] sm:$0xff]  ;;  %s37_s21 = sld [smem:[#allocation3]]  ;;  %v118_v1 = vld [vmem:[%s204_s2] sm:$0xff]  ;;  %vm64_vm2 = vcmask 261120  }
   0x7   :  { %74 = vmatpush.bf16.msra.mxu0 %v119_v0  ;;  %v38_v2 = vld [vmem:[%s203_s1] sm:$0xff]  ;;  %v39_v3 = vld [vmem:[%s203_s1 + $0x8] sm:$0xff]  ;;  %s117_s1 = sld [smem:[#allocation3 + $0x1]] }
   0x8   :  { %v137_v22 = vld [vmem:[%s205_s3] ss:$0 sm:$0xff] }
   0xb   :  { %75 = vmatpush.bf16.msra.mxu0 %v118_v1 }
   0xc   :  { %v40_v4 = vstv %s37_s21 }
   0xd   :  { %v41_v5 = vmul.f32 %v40_v4, %v38_v2  ;;  %v42_v6 = vmul.f32 %v40_v4, %v39_v3  ;;  %v98_v24 = vstv %s117_s1 }
   0xf   :  { %v122_v7 = vcvt.f32.s32 %v41_v5  ;;  %v120_v8 = vand.u32 2147483647, %v41_v5  ;;  %v130_v9 = vcvt.f32.s32 %v42_v6  ;;  %v125_v11 = vand.u32 2147483648, %v41_v5 }
  0x10   :  { %v128_v12 = vand.u32 2147483647, %v42_v6  ;;  %v133_v14 = vand.u32 2147483648, %v42_v6 }
  0x11   :  { %v123_v10 = vcvt.s32.f32 %v122_v7  ;;  %v131_v13 = vcvt.s32.f32 %v130_v9  ;;  %vm121_vm0 = vcmp.lt.f32.partialorder %v120_v8, 8388608.0 }
  0x12   :  { %vm129_vm1 = vcmp.lt.f32.partialorder %v128_v12, 8388608.0 }
  0x13   :  { %v124_v15 = vand.u32 2147483647, %v123_v10  ;;  %v132_v16 = vand.u32 2147483647, %v131_v13 }
  0x15   :  { %v126_v17 = vor.u32 %v125_v11, %v124_v15  ;;  %v134_v18 = vor.u32 %v133_v14, %v132_v16 }
  0x17   :  { %v127_v19 = vsel %vm121_vm0, %v126_v17, %v41_v5  ;;  %v135_v20 = vsel %vm129_vm1, %v134_v18, %v42_v6 }
  0x18   :  { %v45_v21 = vpack.c.bf16 %v135_v20, %v127_v19 }
  0x1a   :  { %116 = vmatmul.msk.bf16.vlgmr.msra.gmra.mxu0 %vm64_vm2, %v45_v21 }
  0x97   :  { %v77_v23 = vpop.f32.mrf.mxu0 }
  0x98   :  { %v95_v25 = vadd.f32 %v137_v22, %v77_v23 }
  0x9a   :  { %v99_v26 = vmul.f32 %v98_v24, %v95_v25 }
  0x9c   :  { %101 = vst [vmem:[%s206_s4] sm:$0xff] %v99_v26 }
  0x9f   :  { %v79_v27 = vpop.f32.mrf.mxu0 }
  0xa0   :  { %v96_v28 = vadd.f32 %v137_v22, %v79_v27 }
  0xa2   :  { %v100_v29 = vmul.f32 %v98_v24, %v96_v28 }
  0xa4   :  { %102 = vst [vmem:[%s206_s4 + $0x8] sm:$0xff] %v100_v29 }
  0xa5   :  { %107 = vsyncpa [#allocation4], 1 }

// kernel: q_block_forward.13
= control target key start
LH: loop header
LB: loop body
LE: loop exit
PB: predicated region body
PF: predicated region fallthrough
CT: control target
= control target key end

     0   :  { %10 = vsyncpa [#allocation5], 0  ;;  %s364_s0 = inlined_call_operand.vmem [shape: f32[2], index: 0, kind: input, shape index: {}]   ;;  %s365_s1 = inlined_call_operand.vmem [shape: f32[16,128], index: 1, kind: input, shape index: {}]   ;;  %s366_s2 = inlined_call_operand.vmem [shape: bf16[128,32], index: 2, kind: input, shape index: {}]   ;;  %s367_s3 = inlined_call_operand.vmem [shape: f32[1,32], index: 3, kind: input, shape index: {}]   ;;  %s368_s4 = inlined_call_operand.vmem [shape: f32[16,32], index: 4, kind: input, shape index: {}]   ;;  %s369_s5 = inlined_call_operand.hbm [shape: f32[16,32], index: 5, kind: output, shape index: {}]  }
   0x1   :  { %11 = vsyncpa [#allocation4], 0  ;;  %s17_s20 = sshll.u32 %s364_s0, 4  ;;  %s278_s21 = smov [#allocation3]   ;;  %s18_s20 = int_to_ptr.vmem [resolvable:$true] %s17_s20 }
   0x2   :  { %20 = dma.vmem_to_smem %s18_s20, 16, %s278_s21, [#allocation5]  }
   0x3   :  { %274 = dma.done.wait [#allocation5], 16  }
   0x4   :  { %275 = vsyncadd [#allocation5], 4294967280 }
   0x5   :  { %33 = sfence }
   0x6   :  { %v215_v0 = vld [vmem:[%s366_s2 + $0x38] sm:$0xff]  ;;  %s41_s24 = sld [smem:[#allocation3]]  ;;  %vm38_vm0 = vcmask 261120   ;;  %v214_v1 = vld [vmem:[%s366_s2 + $0x30] sm:$0xff]  ;;  %v279_v2 = vmov 0.0   ;;  %v42_v3 = vld [vmem:[%s365_s1] sm:$0xff] }
   0x7   :  { %116 = vmatpush.bf16.msra.mxu0 %v215_v0  ;;  %39 = vst.msk [vmem:[#allocation2] sm:$0xff] %vm38_vm0, %v279_v2  ;;  %v43_v4 = vld [vmem:[%s365_s1 + $0x8] sm:$0xff]  ;;  %v212_v9 = vld [vmem:[%s366_s2 + $0x20] sm:$0xff]  ;;  %v211_v12 = vld [vmem:[%s366_s2 + $0x18] sm:$0xff]  ;;  %s207_s16 = sld [smem:[#allocation3 + $0x1]]  ;;  %s280_s20 = smov [#allocation6]  }
   0x8   :  { %40 = vst.msk [vmem:[#allocation2 + $0x8] sm:$0xff] %vm38_vm0, %v279_v2  ;;  %v213_v5 = vld [vmem:[%s366_s2 + $0x28] sm:$0xff]  ;;  %v210_v15 = vld [vmem:[%s366_s2 + $0x10] sm:$0xff]  ;;  %v208_v25 = vld [vmem:[%s366_s2] sm:$0xff]  ;;  %s160_s21 = sshll.u32 %s280_s20, 4  ;;  %s162_s23 = sshll.u32 %s369_s5, 4  ;;  %s161_s21 = int_to_ptr.vmem [resolvable:$true] %s160_s21  ;;  %s163_s23 = int_to_ptr.hbm [resolvable:$true] %s162_s23 }
   0x9   :  { %v209_v22 = vld [vmem:[%s366_s2 + $0x8] sm:$0xff]  ;;  %v237_v33 = vld [vmem:[%s367_s3] ss:$0 sm:$0xff]  ;;  %s281_s26 = smov 128   ;;  %s282_s0 = smov 8  }
   0xa   :  { %v150_v39 = vld [vmem:[%s368_s4] sm:$0xff]  ;;  %v151_v44 = vld [vmem:[%s368_s4 + $0x8] sm:$0xff] }
   0xb   :  { %117 = vmatpush.bf16.msra.mxu0 %v214_v1 }
   0xc   :  { %v44_v6 = vstv %s41_s24 }
   0xd   :  { %v45_v7 = vmul.f32 %v44_v6, %v42_v3  ;;  %v46_v8 = vmul.f32 %v44_v6, %v43_v4  ;;  %v147_v37 = vstv %s207_s16 }
   0xe   :  { %v50_v29 = vld [vmem:[#allocation2] sm:$0xff] }
   0xf   :  { %118 = vmatpush.bf16.msra.mxu0 %v213_v5  ;;  %v218_v10 = vcvt.f32.s32 %v45_v7  ;;  %v226_v11 = vcvt.f32.s32 %v46_v8  ;;  %v221_v17 = vand.u32 2147483648, %v45_v7  ;;  %v229_v19 = vand.u32 2147483648, %v46_v8  ;;  %v51_v32 = vld [vmem:[#allocation2 + $0x8] sm:$0xff] }
  0x10   :  { %v216_v20 = vand.u32 2147483647, %v45_v7  ;;  %v224_v21 = vand.u32 2147483647, %v46_v8 }
  0x11   :  { %v219_v13 = vcvt.s32.f32 %v218_v10  ;;  %v227_v14 = vcvt.s32.f32 %v226_v11 }
  0x12   :  { %vm217_vm1 = vcmp.lt.f32.partialorder %v216_v20, 8388608.0  ;;  %vm225_vm2 = vcmp.lt.f32.partialorder %v224_v21, 8388608.0 }
  0x13   :  { %119 = vmatpush.bf16.msra.mxu0 %v212_v9  ;;  %v220_v16 = vand.u32 2147483647, %v219_v13  ;;  %v228_v18 = vand.u32 2147483647, %v227_v14 }
  0x15   :  { %v222_v23 = vor.u32 %v221_v17, %v220_v16  ;;  %v230_v24 = vor.u32 %v229_v19, %v228_v18 }
  0x17   :  { %120 = vmatpush.bf16.msra.mxu0 %v211_v12  ;;  %v223_v26 = vsel %vm217_vm1, %v222_v23, %v45_v7  ;;  %v231_v27 = vsel %vm225_vm2, %v230_v24, %v46_v8 }
  0x18   :  { %v49_v28 = vpack.c.bf16 %v231_v27, %v223_v26 }
  0x1b   :  { %121 = vmatpush.bf16.msra.mxu0 %v210_v15 }
  0x1f   :  { %122 = vmatpush.bf16.msra.mxu0 %v209_v22 }
  0x23   :  { %123 = vmatpush.bf16.msra.mxu0 %v208_v25 }
  0x26   :  { %124 = vmatmul.bf16.vlgmr.msra.gmra.mxu0 %v49_v28 }
  0xa3   :  { %v125_v30 = vpop.f32.mrf.mxu0 }
  0xa4   :  { %v130_v31 = vadd.f32 %v125_v30, %v50_v29 }
  0xa6   :  { %133 = vst.msk [vmem:[#allocation2] sm:$0xff] %vm38_vm0, %v130_v31 }
  0xab   :  { %v127_v34 = vpop.f32.mrf.mxu0 }
  0xac   :  { %v131_v35 = vadd.f32 %v127_v34, %v51_v32 }
  0xad   :  { %v138_v36 = vld [vmem:[#allocation2] sm:$0xff] }
  0xae   :  { %134 = vst.msk [vmem:[#allocation2 + $0x8] sm:$0xff] %vm38_vm0, %v131_v35  ;;  %v144_v38 = vadd.f32 %v237_v33, %v138_v36 }
  0xb0   :  { %v148_v40 = vmul.f32 %v147_v37, %v144_v38 }
  0xb2   :  { %v152_v41 = vadd.f32 %v150_v39, %v148_v40 }
  0xb4   :  { %154 = vst.msk [vmem:[#allocation6] sm:$0xff] %vm38_vm0, %v152_v41 }
  0xb5   :  { %v139_v42 = vld [vmem:[#allocation2 + $0x8] sm:$0xff] }
  0xb6   :  { %v145_v43 = vadd.f32 %v237_v33, %v139_v42 }
  0xb8   :  { %v149_v45 = vmul.f32 %v147_v37, %v145_v43 }
  0xba   :  { %v153_v46 = vadd.f32 %v151_v44, %v149_v45 }
  0xbc   :  { %155 = vst.msk [vmem:[#allocation6 + $0x8] sm:$0xff] %vm38_vm0, %v153_v46 }
  0xbd   :  { %168 = dma.vmem_to_hbm [thread:$0]  %s161_s21, 256, %s163_s23, [#allocation4], %s281_s26, %s281_s26, %s282_s0  }
  0xbe   :  { %276 = dma.done.wait [#allocation4], 256  }
  0xbf   :  { %277 = vsyncadd [#allocation4], 4294967040 }
  0xc0   :  { %173 = vsyncpa [#allocation4], 1 }
  0xc1   :  { %174 = vsyncpa [#allocation5], 1 }

</bundles_post_ra>
